<compile_context>
chip_gen: v7x
topology: tpu7x:2x2x1
jax: 0.10.0
libtpu: 0.0.40
codegen_flags: <defaults>
</compile_context>

<pallas_src>
import functools

import jax
import jax.numpy as jnp
from jax.experimental import pallas as pl
from jax.experimental.pallas import tpu as pltpu

_LANE = 128
_ROW_ALIGN = 16                  # bf16 sublane packing (multiple of f32's 8)
_VMEM_TILE_TARGET = 40 << 20     # tile-selection budget; fits v7x 64 MiB VMEM


def _round_up(v, m):
    return (v + m - 1) // m * m


def _attn_gated_kernel(x_ref, wab_ref, bab_ref, wc_ref, bc_ref, out_ref, *,
                       d_pad, n_classes):
    # Cast the x tile to the matmul dtype in VMEM (no extra HBM pass over x).
    x = x_ref[...].astype(wab_ref.dtype)

    # Fused attention_a / attention_b matmul: one MXU pass over the x tile,
    # f32 accumulation; bias add + nonlinearities stay f32.
    ab = (jnp.dot(x, wab_ref[...], preferred_element_type=jnp.float32)
          + bab_ref[...])
    a = jnp.tanh(ab[:, :d_pad])                        # Linear + Tanh
    # sigmoid(z) == 0.5 * (1 + tanh(z / 2)) — exact, guaranteed on the EUP.
    b = 0.5 * (jnp.tanh(0.5 * ab[:, d_pad:]) + 1.0)    # Linear + Sigmoid
    gated = (a * b).astype(wc_ref.dtype)               # A = a.mul(b)

    # attention_c: MXU matmul against the lane-padded Wc, then slice to the
    # real n_classes so the HBM writeback is not 128-lane padded.
    out = (jnp.dot(gated, wc_ref[...], preferred_element_type=jnp.float32)
           + bc_ref[...])
    out_ref[...] = out[:, :n_classes].astype(out_ref.dtype)


def prepare_params(params, compute_dtype=jnp.bfloat16):
    """One-time parameter preprocessing (call once, reuse every forward).

    params: dict with wa (L,D), ba (1,D), wb (L,D), bb (1,D), wc (D,C),
            bc (1,C) -- weights already transposed to (in, out) layout.
    Pads to hardware tiles, fuses Wa|Wb into one (L, 2D) weight, casts the
    matmul operands to `compute_dtype` (biases stay f32: accumulator is f32).
    """
    wa, ba, wb, bb, wc, bc = (params["wa"], params["ba"], params["wb"],
                              params["bb"], params["wc"], params["bc"])
    L, D = wa.shape
    C = wc.shape[1]
    L_pad = _round_up(L, _LANE)
    D_pad = _round_up(D, _LANE)
    C_pad = _round_up(C, _LANE)

    def pad2(a, r, c):
        return jnp.pad(a, ((0, r - a.shape[0]), (0, c - a.shape[1])))

    wab = jnp.concatenate([pad2(wa, L_pad, D_pad), pad2(wb, L_pad, D_pad)],
                          axis=1).astype(compute_dtype)      # (L_pad, 2*D_pad)
    bab = jnp.concatenate([pad2(ba, 1, D_pad), pad2(bb, 1, D_pad)],
                          axis=1).astype(jnp.float32)        # (1, 2*D_pad)
    wc_p = pad2(wc, D_pad, C_pad).astype(compute_dtype)      # (D_pad, C_pad)
    bc_p = pad2(bc, 1, C_pad).astype(jnp.float32)            # (1, C_pad)

    return dict(wab=wab, bab=bab, wc=wc_p, bc=bc_p,
                L=L, D=D, C=C, L_pad=L_pad, D_pad=D_pad, C_pad=C_pad)


def _choose_tile_n(N, L_pad, D_pad, C_pad, x_bytes, w_bytes, out_bytes,
                   requested=None):
    req = 1024 if requested is None else requested
    tile = _round_up(max(_ROW_ALIGN, min(req, N)), _ROW_ALIGN)

    def budget(t):
        x_tiles = 2 * t * L_pad * x_bytes                       # 2x x tiles
        o_tiles = 2 * t * max(C_pad, _LANE) * max(out_bytes, 4)  # 2x out tiles
        weights = ((L_pad * 2 * D_pad + D_pad * C_pad) * w_bytes
                   + (2 * D_pad + C_pad) * 4)                   # single-buffered
        inter = 7 * t * D_pad * 4                               # f32 ab/a/b/gated/out
        return x_tiles + o_tiles + weights + inter

    while tile > _ROW_ALIGN and budget(tile) > _VMEM_TILE_TARGET:
        tile -= _ROW_ALIGN

    # v7x has 2 TensorCores: make sure the "parallel" row axis has >= 2 steps.
    if requested is None and tile >= N and N > _ROW_ALIGN:
        tile = _round_up((N + 1) // 2, _ROW_ALIGN)

    return tile, budget(tile)


def attn_net_gated(x, prep, *, tile_n=None):
    """Pallas forward. x: (N, L). Returns (A, x) with A: (N, n_classes)."""
    N, L = x.shape
    assert L == prep["L"], f"x feature dim {L} != prepared L {prep['L']}"
    L_pad, D_pad, C_pad, C = prep["L_pad"], prep["D_pad"], prep["C_pad"], prep["C"]

    x_bytes = x.dtype.itemsize
    w_bytes = prep["wab"].dtype.itemsize
    out_dtype = x.dtype
    out_bytes = x.dtype.itemsize

    tile, vmem_budget = _choose_tile_n(N, L_pad, D_pad, C_pad,
                                       x_bytes, w_bytes, out_bytes, tile_n)
    N_pad = _round_up(N, tile)

    x_p = x
    if N_pad != N or L_pad != L:
        x_p = jnp.pad(x, ((0, N_pad - N), (0, L_pad - L)))

    kernel = functools.partial(_attn_gated_kernel, d_pad=D_pad, n_classes=C)

    cost = pl.CostEstimate(
        flops=2 * N_pad * (L_pad * 2 * D_pad + D_pad * C_pad),
        transcendentals=2 * N_pad * D_pad,
        bytes_accessed=(N_pad * L_pad * x_bytes
                        + (L_pad * 2 * D_pad + D_pad * C_pad) * w_bytes
                        + (2 * D_pad + C_pad) * 4
                        + N_pad * C * out_bytes),
    )
    vmem_limit = int(min(48 << 20, max(32 << 20, vmem_budget + (8 << 20))))
    compiler_params = pltpu.CompilerParams(
        dimension_semantics=("parallel",),    # shard rows across TCs on v7x
        vmem_limit_bytes=vmem_limit,
    )

    def run(resident_kwargs):
        in_specs = [
            pl.BlockSpec((tile, L_pad), lambda i: (i, 0)),                 # x tile
            pl.BlockSpec((L_pad, 2 * D_pad), lambda i: (0, 0), **resident_kwargs),  # Wa|Wb
            pl.BlockSpec((1, 2 * D_pad), lambda i: (0, 0), **resident_kwargs),      # ba|bb
            pl.BlockSpec((D_pad, C_pad), lambda i: (0, 0), **resident_kwargs),      # Wc
            pl.BlockSpec((1, C_pad), lambda i: (0, 0), **resident_kwargs),          # bc
        ]
        return pl.pallas_call(
            kernel,
            out_shape=jax.ShapeDtypeStruct((N_pad, C), out_dtype),
            grid=(N_pad // tile,),
            in_specs=in_specs,
            out_specs=pl.BlockSpec((tile, C), lambda i: (i, 0)),   # lane-unpadded
            compiler_params=compiler_params,
            cost_estimate=cost,
        )(x_p, prep["wab"], prep["bab"], prep["wc"], prep["bc"])

    try:
        # Resident weights never change across the row grid: single-buffer
        # them to free VMEM (matters on v7x 64 MiB / v5e 16 MiB scoped).
        A_pad = run({"pipeline_mode": pl.Buffered(buffer_count=1)})
    except Exception:
        # Fallback: default double-buffering if single-buffering unsupported.
        A_pad = run({})

    A = A_pad if N_pad == N else A_pad[:N]
    return A, x


def init_params(key, L, D, n_classes, dtype=jnp.float32):
    """Deterministic init mimicking torch.nn.Linear default (+-1/sqrt(fan_in))."""
    ks = jax.random.split(key, 6)

    def linear(kw, kb, fan_in, fan_out):
        bound = 1.0 / (fan_in ** 0.5)
        w = jax.random.uniform(kw, (fan_in, fan_out), dtype, -bound, bound)
        b = jax.random.uniform(kb, (1, fan_out), dtype, -bound, bound)
        return w, b

    wa, ba = linear(ks[0], ks[1], L, D)
    wb, bb = linear(ks[2], ks[3], L, D)
    wc, bc = linear(ks[4], ks[5], D, n_classes)
    return dict(wa=wa, ba=ba, wb=wb, bb=bb, wc=wc, bc=bc)


def reference(x, p):
    a = jnp.tanh(x @ p["wa"] + p["ba"])
    b = jax.nn.sigmoid(x @ p["wb"] + p["bb"])
    return (a * b) @ p["wc"] + p["bc"]


if __name__ == "__main__":
    # Small, hardware-aware shapes (L, D multiples of 128; N deliberately NOT
    # a multiple of the tile to exercise padding / row-slicing).
    N, L, D, n_classes = 300, 256, 128, 1

    key = jax.random.PRNGKey(0)
    kx, kp = jax.random.split(key)
    x = jax.random.normal(kx, (N, L), jnp.float32)
    params = init_params(kp, L, D, n_classes)

    A_ref = reference(x, params)

    # Default path: bf16 MXU matmuls with f32 accumulation; params prepared once.
    prep_bf16 = prepare_params(params, compute_dtype=jnp.bfloat16)
    A, x_out = attn_net_gated(x, prep_bf16)
    jax.block_until_ready((A, x_out))
    assert A.shape == (N, n_classes)
    assert x_out.shape == (N, L)
    assert jnp.allclose(A, A_ref, atol=3e-2, rtol=3e-2)
    assert jnp.array_equal(x_out, x)

    # f32 path (near-exact), explicit small tile to exercise a 3-step grid.
    prep_f32 = prepare_params(params, compute_dtype=jnp.float32)
    A32, _ = attn_net_gated(x, prep_f32, tile_n=128)
    jax.block_until_ready(A32)
    assert A32.shape == (N, n_classes)
    assert jnp.allclose(A32, A_ref, atol=1e-4, rtol=1e-4)

    print("KERNEL_OK")
</pallas_src>

<mosaic_0001>
module attributes {stable_mosaic.version = 11 : i64} {
  func.func @_attn_gated_kernel(%arg0: i32, %arg1: memref<160x256xf32, #tpu.memory_space<vmem>>, %arg2: memref<256x256xbf16, #tpu.memory_space<vmem>>, %arg3: memref<1x256xf32, #tpu.memory_space<vmem>>, %arg4: memref<128x128xbf16, #tpu.memory_space<vmem>>, %arg5: memref<1x128xf32, #tpu.memory_space<vmem>>, %arg6: memref<160x1xf32, #tpu.memory_space<vmem>>) attributes {dimension_semantics = [#tpu.dimension_semantics<parallel>], iteration_bounds = array<i64: 2>, scalar_prefetch = 0 : i64, scratch_operands = 0 : i64, tpu.core_type = #tpu.core_type<tc>, window_params = [{transform_indices = @transform_0, window_bounds = array<i64: 160, 256>}, {pipeline_mode = #tpu.pipeline_mode<synchronous>, transform_indices = @transform_1, window_bounds = array<i64: 256, 256>}, {pipeline_mode = #tpu.pipeline_mode<synchronous>, transform_indices = @transform_2, window_bounds = array<i64: 1, 256>}, {pipeline_mode = #tpu.pipeline_mode<synchronous>, transform_indices = @transform_3, window_bounds = array<i64: 128, 128>}, {pipeline_mode = #tpu.pipeline_mode<synchronous>, transform_indices = @transform_4, window_bounds = array<i64: 1, 128>}, {transform_indices = @transform_5, window_bounds = array<i64: 160, 1>}]} {
    %c0 = arith.constant 0 : index
    %c0_0 = arith.constant 0 : index
    %0 = vector.load %arg1[%c0, %c0_0] : memref<160x256xf32, #tpu.memory_space<vmem>>, vector<160x256xf32>
    %1 = arith.truncf %0 : vector<160x256xf32> to vector<160x256xbf16>
    %c0_1 = arith.constant 0 : index
    %c0_2 = arith.constant 0 : index
    %2 = vector.load %arg2[%c0_1, %c0_2] : memref<256x256xbf16, #tpu.memory_space<vmem>>, vector<256x256xbf16>
    %cst = arith.constant dense<0.000000e+00> : vector<160x256xf32>
    %3 = tpu.matmul %1, %2, %cst {dimension_numbers = #tpu.dot_dimension_numbers<[1], [0], [0], [1], [0, 0, 1, 1], [], []>} : vector<160x256xbf16>, vector<256x256xbf16>, vector<160x256xf32> -> vector<160x256xf32>
    %c0_3 = arith.constant 0 : index
    %c0_4 = arith.constant 0 : index
    %4 = vector.load %arg3[%c0_3, %c0_4] : memref<1x256xf32, #tpu.memory_space<vmem>>, vector<1x256xf32>
    %5 = vector.broadcast %4 : vector<1x256xf32> to vector<160x256xf32>
    %6 = arith.addf %3, %5 : vector<160x256xf32>
    %7 = vector.extract_strided_slice %6 {offsets = [0, 0], sizes = [160, 128], strides = [1, 1]} : vector<160x256xf32> to vector<160x128xf32>
    %8 = math.tanh %7 : vector<160x128xf32>
    %9 = vector.extract_strided_slice %6 {offsets = [0, 128], sizes = [160, 128], strides = [1, 1]} : vector<160x256xf32> to vector<160x128xf32>
    %cst_5 = arith.constant 5.000000e-01 : f32
    %10 = vector.broadcast %cst_5 : f32 to vector<160x128xf32>
    %11 = arith.mulf %10, %9 : vector<160x128xf32>
    %12 = math.tanh %11 : vector<160x128xf32>
    %cst_6 = arith.constant 1.000000e+00 : f32
    %13 = vector.broadcast %cst_6 : f32 to vector<160x128xf32>
    %14 = arith.addf %12, %13 : vector<160x128xf32>
    %cst_7 = arith.constant 5.000000e-01 : f32
    %15 = vector.broadcast %cst_7 : f32 to vector<160x128xf32>
    %16 = arith.mulf %15, %14 : vector<160x128xf32>
    %17 = arith.mulf %8, %16 : vector<160x128xf32>
    %18 = arith.truncf %17 : vector<160x128xf32> to vector<160x128xbf16>
    %c0_8 = arith.constant 0 : index
    %c0_9 = arith.constant 0 : index
    %19 = vector.load %arg4[%c0_8, %c0_9] : memref<128x128xbf16, #tpu.memory_space<vmem>>, vector<128x128xbf16>
    %cst_10 = arith.constant dense<0.000000e+00> : vector<160x128xf32>
    %20 = tpu.matmul %18, %19, %cst_10 {dimension_numbers = #tpu.dot_dimension_numbers<[1], [0], [0], [1], [0, 0, 1, 1], [], []>} : vector<160x128xbf16>, vector<128x128xbf16>, vector<160x128xf32> -> vector<160x128xf32>
    %c0_11 = arith.constant 0 : index
    %c0_12 = arith.constant 0 : index
    %21 = vector.load %arg5[%c0_11, %c0_12] : memref<1x128xf32, #tpu.memory_space<vmem>>, vector<1x128xf32>
    %22 = vector.broadcast %21 : vector<1x128xf32> to vector<160x128xf32>
    %23 = arith.addf %20, %22 : vector<160x128xf32>
    %24 = vector.extract_strided_slice %23 {offsets = [0, 0], sizes = [160, 1], strides = [1, 1]} : vector<160x128xf32> to vector<160x1xf32>
    %c0_13 = arith.constant 0 : index
    %c0_14 = arith.constant 0 : index
    %25 = vector.load %arg6[%c0_13, %c0_14] : memref<160x1xf32, #tpu.memory_space<vmem>>, vector<160x1xf32>
    tpu.vector_store %arg6[%c0_13, %c0_14], %24 {strides = array<i32>} : memref<160x1xf32, #tpu.memory_space<vmem>>, vector<160x1xf32>,
    return
  }
  func.func @transform_0(%arg0: i32) -> (i32, i32) {
    %c0_i32 = arith.constant 0 : i32
    %c0_i32_0 = arith.constant 0 : i32
    return %arg0, %c0_i32 : i32, i32
  }
  func.func @transform_1(%arg0: i32) -> (i32, i32) {
    %c0_i32 = arith.constant 0 : i32
    %c0_i32_0 = arith.constant 0 : i32
    %c0_i32_1 = arith.constant 0 : i32
    return %c0_i32, %c0_i32_0 : i32, i32
  }
  func.func @transform_2(%arg0: i32) -> (i32, i32) {
    %c0_i32 = arith.constant 0 : i32
    %c0_i32_0 = arith.constant 0 : i32
    %c0_i32_1 = arith.constant 0 : i32
    return %c0_i32, %c0_i32_0 : i32, i32
  }
  func.func @transform_3(%arg0: i32) -> (i32, i32) {
    %c0_i32 = arith.constant 0 : i32
    %c0_i32_0 = arith.constant 0 : i32
    %c0_i32_1 = arith.constant 0 : i32
    return %c0_i32, %c0_i32_0 : i32, i32
  }
  func.func @transform_4(%arg0: i32) -> (i32, i32) {
    %c0_i32 = arith.constant 0 : i32
    %c0_i32_0 = arith.constant 0 : i32
    %c0_i32_1 = arith.constant 0 : i32
    return %c0_i32, %c0_i32_0 : i32, i32
  }
  func.func @transform_5(%arg0: i32) -> (i32, i32) {
    %c0_i32 = arith.constant 0 : i32
    %c0_i32_0 = arith.constant 0 : i32
    return %arg0, %c0_i32 : i32, i32
  }
}

module attributes {stable_mosaic.version = 11 : i64} {
  func.func @_attn_gated_kernel(%arg0: i32, %arg1: memref<160x256xf32, #tpu.memory_space<vmem>>, %arg2: memref<256x256xbf16, #tpu.memory_space<vmem>>, %arg3: memref<1x256xf32, #tpu.memory_space<vmem>>, %arg4: memref<128x128xbf16, #tpu.memory_space<vmem>>, %arg5: memref<1x128xf32, #tpu.memory_space<vmem>>, %arg6: memref<160x1xf32, #tpu.memory_space<vmem>>) attributes {dimension_semantics = [#tpu.dimension_semantics<parallel>], iteration_bounds = array<i64: 2>, scalar_prefetch = 0 : i64, scratch_operands = 0 : i64, tpu.core_type = #tpu.core_type<tc>, window_params = [{transform_indices = @transform_0, window_bounds = array<i64: 160, 256>}, {pipeline_mode = #tpu.pipeline_mode<synchronous>, transform_indices = @transform_1, window_bounds = array<i64: 256, 256>}, {pipeline_mode = #tpu.pipeline_mode<synchronous>, transform_indices = @transform_2, window_bounds = array<i64: 1, 256>}, {pipeline_mode = #tpu.pipeline_mode<synchronous>, transform_indices = @transform_3, window_bounds = array<i64: 128, 128>}, {pipeline_mode = #tpu.pipeline_mode<synchronous>, transform_indices = @transform_4, window_bounds = array<i64: 1, 128>}, {transform_indices = @transform_5, window_bounds = array<i64: 160, 1>}]} {
    %c0 = arith.constant 0 : index
    %c0_0 = arith.constant 0 : index
    %0 = vector.load %arg1[%c0, %c0_0] : memref<160x256xf32, #tpu.memory_space<vmem>>, vector<160x256xf32>
    %1 = arith.truncf %0 : vector<160x256xf32> to vector<160x256xbf16>
    %c0_1 = arith.constant 0 : index
    %c0_2 = arith.constant 0 : index
    %2 = vector.load %arg2[%c0_1, %c0_2] : memref<256x256xbf16, #tpu.memory_space<vmem>>, vector<256x256xbf16>
    %cst = arith.constant dense<0.000000e+00> : vector<160x256xf32>
    %3 = tpu.matmul %1, %2, %cst {dimension_numbers = #tpu.dot_dimension_numbers<[1], [0], [0], [1], [0, 0, 1, 1], [], []>} : vector<160x256xbf16>, vector<256x256xbf16>, vector<160x256xf32> -> vector<160x256xf32>
    %c0_3 = arith.constant 0 : index
    %c0_4 = arith.constant 0 : index
    %4 = vector.load %arg3[%c0_3, %c0_4] : memref<1x256xf32, #tpu.memory_space<vmem>>, vector<1x256xf32>
    %5 = vector.broadcast %4 : vector<1x256xf32> to vector<160x256xf32>
    %6 = arith.addf %3, %5 : vector<160x256xf32>
    %7 = vector.extract_strided_slice %6 {offsets = [0, 0], sizes = [160, 128], strides = [1, 1]} : vector<160x256xf32> to vector<160x128xf32>
    %8 = math.tanh %7 : vector<160x128xf32>
    %9 = vector.extract_strided_slice %6 {offsets = [0, 128], sizes = [160, 128], strides = [1, 1]} : vector<160x256xf32> to vector<160x128xf32>
    %cst_5 = arith.constant 5.000000e-01 : f32
    %10 = vector.broadcast %cst_5 : f32 to vector<160x128xf32>
    %11 = arith.mulf %10, %9 : vector<160x128xf32>
    %12 = math.tanh %11 : vector<160x128xf32>
    %cst_6 = arith.constant 1.000000e+00 : f32
    %13 = vector.broadcast %cst_6 : f32 to vector<160x128xf32>
    %14 = arith.addf %12, %13 : vector<160x128xf32>
    %cst_7 = arith.constant 5.000000e-01 : f32
    %15 = vector.broadcast %cst_7 : f32 to vector<160x128xf32>
    %16 = arith.mulf %15, %14 : vector<160x128xf32>
    %17 = arith.mulf %8, %16 : vector<160x128xf32>
    %18 = arith.truncf %17 : vector<160x128xf32> to vector<160x128xbf16>
    %c0_8 = arith.constant 0 : index
    %c0_9 = arith.constant 0 : index
    %19 = vector.load %arg4[%c0_8, %c0_9] : memref<128x128xbf16, #tpu.memory_space<vmem>>, vector<128x128xbf16>
    %cst_10 = arith.constant dense<0.000000e+00> : vector<160x128xf32>
    %20 = tpu.matmul %18, %19, %cst_10 {dimension_numbers = #tpu.dot_dimension_numbers<[1], [0], [0], [1], [0, 0, 1, 1], [], []>} : vector<160x128xbf16>, vector<128x128xbf16>, vector<160x128xf32> -> vector<160x128xf32>
    %c0_11 = arith.constant 0 : index
    %c0_12 = arith.constant 0 : index
    %21 = vector.load %arg5[%c0_11, %c0_12] : memref<1x128xf32, #tpu.memory_space<vmem>>, vector<1x128xf32>
    %22 = vector.broadcast %21 : vector<1x128xf32> to vector<160x128xf32>
    %23 = arith.addf %20, %22 : vector<160x128xf32>
    %24 = vector.extract_strided_slice %23 {offsets = [0, 0], sizes = [160, 1], strides = [1, 1]} : vector<160x128xf32> to vector<160x1xf32>
    %c0_13 = arith.constant 0 : index
    %c0_14 = arith.constant 0 : index
    %25 = vector.load %arg6[%c0_13, %c0_14] : memref<160x1xf32, #tpu.memory_space<vmem>>, vector<160x1xf32>
    tpu.vector_store %arg6[%c0_13, %c0_14], %24 {strides = array<i32>} : memref<160x1xf32, #tpu.memory_space<vmem>>, vector<160x1xf32>,
    return
  }
  func.func @transform_0(%arg0: i32) -> (i32, i32) {
    %c0_i32 = arith.constant 0 : i32
    %c0_i32_0 = arith.constant 0 : i32
    return %arg0, %c0_i32 : i32, i32
  }
  func.func @transform_1(%arg0: i32) -> (i32, i32) {
    %c0_i32 = arith.constant 0 : i32
    %c0_i32_0 = arith.constant 0 : i32
    %c0_i32_1 = arith.constant 0 : i32
    return %c0_i32, %c0_i32_0 : i32, i32
  }
  func.func @transform_2(%arg0: i32) -> (i32, i32) {
    %c0_i32 = arith.constant 0 : i32
    %c0_i32_0 = arith.constant 0 : i32
    %c0_i32_1 = arith.constant 0 : i32
    return %c0_i32, %c0_i32_0 : i32, i32
  }
  func.func @transform_3(%arg0: i32) -> (i32, i32) {
    %c0_i32 = arith.constant 0 : i32
    %c0_i32_0 = arith.constant 0 : i32
    %c0_i32_1 = arith.constant 0 : i32
    return %c0_i32, %c0_i32_0 : i32, i32
  }
  func.func @transform_4(%arg0: i32) -> (i32, i32) {
    %c0_i32 = arith.constant 0 : i32
    %c0_i32_0 = arith.constant 0 : i32
    %c0_i32_1 = arith.constant 0 : i32
    return %c0_i32, %c0_i32_0 : i32, i32
  }
  func.func @transform_5(%arg0: i32) -> (i32, i32) {
    %c0_i32 = arith.constant 0 : i32
    %c0_i32_0 = arith.constant 0 : i32
    return %arg0, %c0_i32 : i32, i32
  }
}

</mosaic_0001>

<bundles_post_ra>
// kernel: tpu_custom_call.1
= control target key start
LH: loop header
LB: loop body
LE: loop exit
PB: predicated region body
PF: predicated region fallthrough
CT: control target
= control target key end

     0   :  { %10 = vsyncpa [#allocation3], 0  ;;  %s1889_s0 = inlined_call_operand.hbm [shape: f32[320,256], index: 0, kind: input, shape index: {}]   ;;  %s1890_s1 = inlined_call_operand.hbm [shape: bf16[256,256], index: 1, kind: input, shape index: {}]   ;;  %s1891_s2 = inlined_call_operand.vmem [shape: f32[1,256], index: 2, kind: input, shape index: {}]   ;;  %s1892_s3 = inlined_call_operand.hbm [shape: bf16[128,128], index: 3, kind: input, shape index: {}]   ;;  %s1893_s4 = inlined_call_operand.vmem [shape: f32[1,128], index: 4, kind: input, shape index: {}]   ;;  %s1894_s5 = inlined_call_operand.vmem [shape: f32[320,1], index: 5, kind: output, shape index: {}]  }
   0x1   :  { %12 = vsyncpa [#allocation3 + $0x1], 0 }
   0x2   :  { %13 = vsyncpa [#allocation5], 0  ;;  %s1577_s18 = smov 0   ;;  %s1579_s19 = smov 0  }
   0x3   :  { %s1581_s20 = smov 0   ;;  %s1583_s21 = smov 0  }
   0x4 LB: > { %s1096_s22 = sadd.s32 4294967295, %s1536_s21   ;;  %p39_p0 = scmp.ne.s32.totalorder %s1528_s19, %s1524_s18  ;;  %s1536_s21 = sphi %s1583_s21, %s1910_s21   ;;  %s1532_s20 = sphi %s1581_s20, %s1909_s20   ;;  %s1528_s19 = sphi %s1579_s19, %s1908_s19   ;;  %s1524_s18 = sphi %s1577_s18, %s1907_s18  }
   0x5   : > { %p1599_p1 = scmp.eq.s32.totalorder %s1096_s22, 0  ;;  %p1098_p2 = scmp.ge.s32.totalorder %s1536_s21, 1 }
   0x6   : > { %p160_p3 = scmp.lt.s32.totalorder %s1536_s21, 3  ;;  %s1538_s26 = smov [#allocation4]  }
   0x7   : > { %s1899_s23 = scalar_select %p1599_p1, 1, 0 }
   0x8   : > { %p1607_p4 = por %p1599_p1, %p39_p0  ;;  %p1611_p5 = pnand %p1098_p2, %p160_p3 }
   0x9   : > { %s172_s27 = sshll.u32 %s1538_s26, 4  ;;  %s1539_s29 = smov [#allocation6]   ;;  %s173_s27 = int_to_ptr.vmem [resolvable:$true] %s172_s27 }
   0xa   : > { %s1900_s24 = scalar_select %p1607_p4, 1, 0 }
   0xb   : > { %s1901_s25 = scalar_select %p1611_p5, 1, 0 }
   0xc   : > { %p1220_p6 = pneg %p1611_p5  ;;  %s188_s30 = sshll.u32 %s1539_s29, 4  ;;  %s1623_s30 = int_to_ptr.vmem [resolvable:$true] %s188_s30 }
   0xd   : > { %s1412_s8 = scalar_lea.hbm %s1890_s1, 4096 }
   0xe   : > { %p1619_p7 = pnand %p1220_p6, %p1599_p1  ;;  %p1413_p8 = scmp.ne.s32.totalorder %s1890_s1, %s1412_s8 }
   0xf   : > { %p1419_p12 = scmp.lt.u32.totalorder %s1412_s8, %s1890_s1 }
  0x10   : > { %p1414_p9 = pneg %p1619_p7 }
  0x12   : > { %p1415_p10 = pnand %p1414_p9, %p1413_p8 }
  0x14   : > { %p1416_p11 = pneg %p1415_p10 }
  0x16   : > { %p1421_p13 = pnand %p1419_p12, %p1416_p11 }
  0x18   : > { %1424 = shalt.err (!%p1421_p13)
}
  0x19   : > { %s1425_s13 = scalar_lea.vmem %s173_s27, 4096  ;;  %p1433_p6 = scmp.lt.s32.totalorder %s173_s27, %s173_s27 }
  0x1a   : > { %p1426_p0 = scmp.ne.s32.totalorder %s173_s27, %s1425_s13  ;;  %p1434_p1 = scmp.lt.s32.totalorder %s1425_s13, %s1425_s13 }
  0x1c   : > { %p1428_p2 = pnand %p1426_p0, %p1414_p9  ;;  %p1435_p4 = por %p1434_p1, %p1433_p6 }
  0x1e   : > { %p1429_p3 = pneg %p1428_p2 }
  0x20   : > { %p1436_p5 = pnand %p1435_p4, %p1429_p3 }
  0x22   : > { %1439 = shalt.err (!%p1436_p5)
}
  0x23   : > { %s1540_s14 = smov 128   ;;  %s1541_s15 = smov 8  }
  0x24   : > { %1223 = dma.hbm_to_vmem [thread:$0]  (!%p1619_p7), %s1890_s1, 4096, %s173_s27, [#allocation5], %s1540_s14, %s1540_s14, %s1541_s15  }
  0x25   : > { %s1440_s29 = scalar_lea.hbm %s1892_s3, 1024 }
  0x26   : > { %p1441_p8 = scmp.ne.s32.totalorder %s1892_s3, %s1440_s29  ;;  %p1447_p5 = scmp.lt.u32.totalorder %s1440_s29, %s1892_s3 }
  0x28   : > { %p1443_p1 = pnand %p1441_p8, %p1414_p9 }
  0x2a   : > { %p1444_p4 = pneg %p1443_p1 }
  0x2c   : > { %p1449_p10 = pnand %p1447_p5, %p1444_p4 }
  0x2e   : > { %1452 = shalt.err (!%p1449_p10)
}
  0x2f   : > { %s1453_s27 = scalar_lea.vmem %s1623_s30, 1024  ;;  %p1461_p0 = scmp.lt.s32.totalorder %s1623_s30, %s1623_s30 }
  0x30   : > { %p1454_p11 = scmp.ne.s32.totalorder %s1623_s30, %s1453_s27  ;;  %p1462_p2 = scmp.lt.s32.totalorder %s1453_s27, %s1453_s27 }
  0x32   : > { %p1456_p12 = pnand %p1454_p11, %p1414_p9  ;;  %p1463_p3 = por %p1462_p2, %p1461_p0 }
  0x34   : > { %p1457_p13 = pneg %p1456_p12 }
  0x36   : > { %p1464_p6 = pnand %p1463_p3, %p1457_p13 }
  0x38   : > { %1467 = shalt.err (!%p1464_p6)
}
  0x39   : > { %s1542_s10 = smov 64   ;;  %s1543_s11 = smov 4  }
  0x3a   : > { %1226 = dma.hbm_to_vmem [thread:$0]  (!%p1619_p7), %s1892_s3, 1024, %s1623_s30, [#allocation5], %s1542_s10, %s1542_s10, %s1543_s11  }
  0x3b   : > { %s1673_s14 = sadd.s32 1, %s1536_s21   ;;  %s26_s16 = sadd.s32 1, %s1532_s20 }
  0x3c   : > { %s23_s15 = ssub.s32 %s1536_s21, %s1673_s14  ;;  %p33_p8 = scmp.ne.s32.totalorder %s1532_s20, %s1528_s19 }
  0x3d   : > { %p24_p9 = scmp.eq.s32.totalorder %s23_s15, 0  ;;  %p34_p1 = scmp.eq.s32.totalorder %s1536_s21, 0 }
  0x3e   : > { %p1233_p5 = scmp.lt.s32.totalorder %s1536_s21, 2  ;;  %s205_s18 = sand.u32 1, %s1532_s20  }
  0x3f   : > { %s1682_s17 = scalar_select %p24_p9, %s1532_s20, %s26_s16  }
  0x40   : > { %p35_p4 = por %p34_p1, %p33_p8  ;;  %s1153_s26 = smul.u32 5120, %s1536_s21 }
  0x41   : > { %s1208_s29 = smul.u32 320, %s205_s18  ;;  %s1698_s27 = scalar_lea.sflag [#allocation3], %s205_s18 }
  0x42   : > { %s1690_s7 = scalar_lea.hbm %s1889_s0, %s1153_s26  ;;  %p1692_p7 = pnand %p1233_p5, %p35_p4 }
  0x43   : > { %s209_s8 = scalar_lea.vmem [#allocation2], %s1208_s29  ;;  %s1468_s10 = scalar_lea.hbm %s1690_s7, 5120 }
  0x44   : > { %s217_s9 = sshll.u32 %s209_s8, 4  ;;  %p1469_p10 = scmp.ne.s32.totalorder %s1690_s7, %s1468_s10  ;;  %s1696_s9 = int_to_ptr.vmem [resolvable:$true] %s217_s9 }
  0x45   : > { %p1470_p11 = pneg %p1692_p7  ;;  %s1473_s13 = scalar_lea.hbm %s1889_s0, 10240 }
  0x46   : > { %p1474_p0 = scmp.lt.u32.totalorder %s1690_s7, %s1889_s0  ;;  %p1475_p2 = scmp.lt.u32.totalorder %s1473_s13, %s1468_s10 }
  0x47   : > { %p1471_p12 = pnand %p1470_p11, %p1469_p10  ;;  %p1477_p6 = scmp.lt.u32.totalorder %s1468_s10, %s1690_s7 }
  0x48   : > { %p1476_p3 = por %p1475_p2, %p1474_p0 }
  0x49   : > { %p1472_p13 = pneg %p1471_p12 }
  0x4a   : > { %p1478_p9 = por %p1477_p6, %p1476_p3 }
  0x4c   : > { %p1479_p8 = pnand %p1478_p9, %p1472_p13 }
  0x4e   : > { %1482 = shalt.err (!%p1479_p8)
}
  0x4f   : > { %s1483_s18 = scalar_lea.vmem %s1696_s9, 5120  ;;  %s1544_s26 = smov [#allocation2]  }
  0x50   : > { %p1484_p1 = scmp.ne.s32.totalorder %s1696_s9, %s1483_s18  ;;  %s1488_s29 = sshll.u32 %s1544_s26, 4  ;;  %s1489_s29 = int_to_ptr.vmem [resolvable:$false] %s1488_s29 }
  0x51   : > { %s1490_s28 = scalar_lea.vmem %s1489_s29, 10240  ;;  %p1491_p10 = scmp.lt.s32.totalorder %s1696_s9, %s1489_s29 }
  0x52   : > { %p1486_p4 = pnand %p1484_p1, %p1470_p11  ;;  %p1492_p12 = scmp.lt.s32.totalorder %s1490_s28, %s1483_s18 }
  0x54   : > { %p1487_p5 = pneg %p1486_p4  ;;  %p1493_p0 = por %p1492_p12, %p1491_p10 }
  0x56   : > { %p1494_p2 = pnand %p1493_p0, %p1487_p5 }
  0x58   : > { %1497 = shalt.err (!%p1494_p2)
}
  0x59   : > { %s1545_s6 = smov 256   ;;  %s1546_s8 = smov 16  }
  0x5a   : > { %1230 = dma.hbm_to_vmem [thread:$0]  (!%p1692_p7), %s1690_s7, 5120, %s1696_s9, %s1698_s27, %s1545_s6, %s1545_s6, %s1546_s8  }
  0x5b   : > { %p1904_p11 = scmp.ne.s32.totalorder %s1901_s25, 0 }
  0x5c   : > { %s231_s10 = sand.u32 (!%p1904_p11), 1, %s1528_s19   ;;  %p1905_p13 = scmp.ne.s32.totalorder (!%p1904_p11), %s1900_s24, 0 }
  0x5d   : > { %229 = sbr.rel (%p1904_p11) target bundleno = 697 (0x2b9), region = 40  ;;  %s232_s12 = scalar_lea.sflag (!%p1904_p11), [#allocation3], %s231_s10 }
  0x5e   : > { %s1209_s11 = smul.u32 (!%p1904_p11), 320, %s231_s10 }
  0x60   : > { %s1729_s13 = scalar_lea.vmem (!%p1904_p11), [#allocation2], %s1209_s11 }
  0x64   : > { %1515 = dma.done.wait (%p1905_p13), %s232_s12, 5120  }
  0x65   : > { %1517 = vsyncadd (%p1905_p13), %s232_s12, 4294962176  ;;  %p1906_p3 = scmp.ne.s32.totalorder %s1899_s23, 0 }
  0x67   : > { %1519 = dma.done.wait (%p1906_p3), [#allocation5], 5120  }
  0x68   : > { %1521 = vsyncadd (%p1906_p3), [#allocation5], 4294962176  ;;  %v1276_v0 = vld [vmem:[#allocation4 + $0x4] ss:$8 sps:$4 sm:$0xff]   ;;  %v1278_v1 = vld [vmem:[#allocation4] ss:$8 sps:$4 sm:$0xff]  }
  0x69   : > { %542 = vmatprep.subr.bf16.mxu0 %v1276_v0  ;;  %v1279_v2 = vld [vmem:[#allocation4 + $0x14] ss:$8 sps:$4 sm:$0xff]   ;;  %v1281_v3 = vld [vmem:[#allocation4 + $0x10] ss:$8 sps:$4 sm:$0xff]   ;;  %v1282_v4 = vld [vmem:[#allocation4 + $0x24] ss:$8 sps:$4 sm:$0xff]  }
  0x6a   : > { %543 = vmatpush1.bf16.msra.mxu0 %v1278_v1  ;;  %v1284_v5 = vld [vmem:[#allocation4 + $0x20] ss:$8 sps:$4 sm:$0xff]   ;;  %v1285_v6 = vld [vmem:[#allocation4 + $0x34] ss:$8 sps:$4 sm:$0xff]   ;;  %v1287_v7 = vld [vmem:[#allocation4 + $0x30] ss:$8 sps:$4 sm:$0xff]  }
  0x6b   : > { %544 = vmatprep.subr.bf16.mxu0 %v1279_v2  ;;  %v1288_v8 = vld [vmem:[#allocation4 + $0x44] ss:$8 sps:$4 sm:$0xff]   ;;  %v1290_v9 = vld [vmem:[#allocation4 + $0x40] ss:$8 sps:$4 sm:$0xff]   ;;  %v1291_v10 = vld [vmem:[#allocation4 + $0x54] ss:$8 sps:$4 sm:$0xff]  }
  0x6c   : > { %v1293_v11 = vld [vmem:[#allocation4 + $0x50] ss:$8 sps:$4 sm:$0xff]   ;;  %v1294_v12 = vld [vmem:[#allocation4 + $0x64] ss:$8 sps:$4 sm:$0xff]   ;;  %v1296_v16 = vld [vmem:[#allocation4 + $0x60] ss:$8 sps:$4 sm:$0xff]  }
  0x6d   : > { %v279_v13 = vld [vmem:[%s1729_s13 + $0x8] sm:$0xff]  ;;  %v281_v14 = vld [vmem:[%s1729_s13 + $0x18] sm:$0xff]  ;;  %v278_v35 = vld [vmem:[%s1729_s13] sm:$0xff]  ;;  %s271_s25 = smul.u32 20, %s1096_s22  ;;  %vm989_vm0 = vcmask 7168  }
  0x6e   : > { %545 = vmatpush1.bf16.msra.mxu0 %v1281_v3  ;;  %v319_v15 = vpack.c.bf16 %v281_v14, %v279_v13  ;;  %v1297_v17 = vld [vmem:[#allocation4 + $0x74] ss:$8 sps:$4 sm:$0xff]   ;;  %v1299_v18 = vld [vmem:[#allocation4 + $0x70] ss:$8 sps:$4 sm:$0xff]   ;;  %v1300_v19 = vld [vmem:[#allocation4 + $0x84] ss:$8 sps:$4 sm:$0xff]  }
  0x6f   : > { %546 = vmatprep.subr.bf16.mxu0 %v1282_v4  ;;  %v1302_v20 = vld [vmem:[#allocation4 + $0x80] ss:$8 sps:$4 sm:$0xff]   ;;  %v1303_v21 = vld [vmem:[#allocation4 + $0x94] ss:$8 sps:$4 sm:$0xff]   ;;  %v1305_v22 = vld [vmem:[#allocation4 + $0x90] ss:$8 sps:$4 sm:$0xff]  }
  0x70   : > { %574 = vmatprep.mubr.bf16.mxu0 %v319_v15  ;;  %v1306_v23 = vld [vmem:[#allocation4 + $0xa4] ss:$8 sps:$4 sm:$0xff]   ;;  %v1308_v24 = vld [vmem:[#allocation4 + $0xa0] ss:$8 sps:$4 sm:$0xff]   ;;  %v1309_v25 = vld [vmem:[#allocation4 + $0xb4] ss:$8 sps:$4 sm:$0xff]  }
  0x71   : > { %v1311_v26 = vld [vmem:[#allocation4 + $0xb0] ss:$8 sps:$4 sm:$0xff]   ;;  %v1312_v27 = vld [vmem:[#allocation4 + $0xc4] ss:$8 sps:$4 sm:$0xff]   ;;  %v1314_v28 = vld [vmem:[#allocation4 + $0xc0] ss:$8 sps:$4 sm:$0xff]  }
  0x72   : > { %547 = vmatpush1.bf16.msra.mxu0 %v1284_v5  ;;  %v1315_v29 = vld [vmem:[#allocation4 + $0xd4] ss:$8 sps:$4 sm:$0xff]   ;;  %v1317_v30 = vld [vmem:[#allocation4 + $0xd0] ss:$8 sps:$4 sm:$0xff]   ;;  %v1318_v31 = vld [vmem:[#allocation4 + $0xe4] ss:$8 sps:$4 sm:$0xff]  }
  0x73   : > { %548 = vmatprep.subr.bf16.mxu0 %v1285_v6  ;;  %v1320_v32 = vld [vmem:[#allocation4 + $0xe0] ss:$8 sps:$4 sm:$0xff]   ;;  %v1321_v33 = vld [vmem:[#allocation4 + $0xf4] ss:$8 sps:$4 sm:$0xff]   ;;  %v1323_v34 = vld [vmem:[#allocation4 + $0xf0] ss:$8 sps:$4 sm:$0xff]  }
  0x74   : > { %v280_v36 = vld [vmem:[%s1729_s13 + $0x10] sm:$0xff]  ;;  %v283_v37 = vld [vmem:[%s1729_s13 + $0x28] sm:$0xff]  ;;  %v285_v38 = vld [vmem:[%s1729_s13 + $0x38] sm:$0xff]  ;;  %p272_p7 = scmp.lt.s32.totalorder %s271_s25, 39 }
  0x75   : > { %v318_v39 = vpack.c.bf16 %v280_v36, %v278_v35  ;;  %v321_v40 = vpack.c.bf16 %v285_v38, %v283_v37  ;;  %v282_v41 = vld [vmem:[%s1729_s13 + $0x20] sm:$0xff]  ;;  %v284_v42 = vld [vmem:[%s1729_s13 + $0x30] sm:$0xff]  ;;  %v287_v43 = vld [vmem:[%s1729_s13 + $0x48] sm:$0xff]  ;;  %v372_v36 = vlaneseq }
  0x76   : > { %549 = vmatpush1.bf16.msra.mxu0 %v1287_v7  ;;  %v289_v44 = vld [vmem:[%s1729_s13 + $0x58] sm:$0xff]  ;;  %v320_v45 = vpack.c.bf16 %v284_v42, %v282_v41  ;;  %v286_v47 = vld [vmem:[%s1729_s13 + $0x40] sm:$0xff]  ;;  %v288_v48 = vld [vmem:[%s1729_s13 + $0x50] sm:$0xff]  ;;  %s1912_s25 = smov (!%p272_p7, %s271_s25), 39 }
  0x77   : > { %550 = vmatprep.subr.bf16.mxu0 %v1288_v8  ;;  %v323_v46 = vpack.c.bf16 %v289_v44, %v287_v43  ;;  %v291_v49 = vld [vmem:[%s1729_s13 + $0x68] sm:$0xff]  ;;  %v293_v50 = vld [vmem:[%s1729_s13 + $0x78] sm:$0xff]  ;;  %v322_v51 = vpack.c.bf16 %v288_v48, %v286_v47  ;;  %v290_v53 = vld [vmem:[%s1729_s13 + $0x60] sm:$0xff]  ;;  %v373_v37 = vshrl.u32 %v372_v36, 7  ;;  %s1107_s7 = sshll.u32 %s1912_s25, 3 }
  0x78   : > { %v325_v52 = vpack.c.bf16 %v293_v50, %v291_v49  ;;  %v292_v54 = vld [vmem:[%s1729_s13 + $0x70] sm:$0xff]  ;;  %v295_v55 = vld [vmem:[%s1729_s13 + $0x88] sm:$0xff]  ;;  %v297_v56 = vld [vmem:[%s1729_s13 + $0x98] sm:$0xff]  ;;  %s1834_s16 = scalar_lea.vmem %s1894_s5, %s1107_s7 }
  0x79   : > { %v324_v57 = vpack.c.bf16 %v292_v54, %v290_v53  ;;  %v327_v58 = vpack.c.bf16 %v297_v56, %v295_v55  ;;  %v294_v59 = vld [vmem:[%s1729_s13 + $0x80] sm:$0xff]  ;;  %v296_v60 = vld [vmem:[%s1729_s13 + $0x90] sm:$0xff]  ;;  %v299_v61 = vld [vmem:[%s1729_s13 + $0xa8] sm:$0xff]  ;;  %v378_v38 = vsub.s32 1, %v373_v37 }
  0x7a   : > { %551 = vmatpush1.bf16.msra.mxu0 %v1290_v9  ;;  %v301_v62 = vld [vmem:[%s1729_s13 + $0xb8] sm:$0xff]  ;;  %v326_v63 = vpack.c.bf16 %v296_v60, %v294_v59  ;;  %v298_v1 = vld [vmem:[%s1729_s13 + $0xa0] sm:$0xff]  ;;  %v300_v2 = vld [vmem:[%s1729_s13 + $0xb0] sm:$0xff] }
  0x7b   : > { %552 = vmatprep.subr.bf16.mxu0 %v1291_v10  ;;  %v329_v0 = vpack.c.bf16 %v301_v62, %v299_v61  ;;  %v303_v3 = vld [vmem:[%s1729_s13 + $0xc8] sm:$0xff]  ;;  %v305_v4 = vld [vmem:[%s1729_s13 + $0xd8] sm:$0xff]  ;;  %v328_v5 = vpack.c.bf16 %v300_v2, %v298_v1  ;;  %v302_v7 = vld [vmem:[%s1729_s13 + $0xc0] sm:$0xff] }
  0x7c   : > { %v331_v6 = vpack.c.bf16 %v305_v4, %v303_v3  ;;  %v304_v8 = vld [vmem:[%s1729_s13 + $0xd0] sm:$0xff]  ;;  %v307_v9 = vld [vmem:[%s1729_s13 + $0xe8] sm:$0xff]  ;;  %v309_v10 = vld [vmem:[%s1729_s13 + $0xf8] sm:$0xff] }
  0x7d   : > { %v306_v13 = vld [vmem:[%s1729_s13 + $0xe0] sm:$0xff]  ;;  %v308_v14 = vld [vmem:[%s1729_s13 + $0xf0] sm:$0xff]  ;;  %v311_v15 = vld [vmem:[%s1729_s13 + $0x108] sm:$0xff] }
  0x7e   : > { %553 = vmatpush1.bf16.msra.mxu0 %v1293_v11  ;;  %v330_v11 = vpack.c.bf16 %v304_v8, %v302_v7  ;;  %v1331_v35 = vld [vmem:[#allocation6 + $0x38] sm:$0xff]  }
  0x7f   : > { %554 = vmatprep.subr.bf16.mxu0 %v1294_v12  ;;  %v333_v12 = vpack.c.bf16 %v309_v10, %v307_v9 }
  0x82   : > { %555 = vmatpush1.bf16.msra.mxu0 %v1296_v16  ;;  %v313_v16 = vld [vmem:[%s1729_s13 + $0x118] sm:$0xff] }
  0x83   : > { %556 = vmatprep.subr.bf16.mxu0 %v1297_v17  ;;  %v332_v17 = vpack.c.bf16 %v308_v14, %v306_v13 }
  0x86   : > { %557 = vmatpush1.bf16.msra.mxu0 %v1299_v18  ;;  %v335_v18 = vpack.c.bf16 %v313_v16, %v311_v15 }
  0x87   : > { %558 = vmatprep.subr.bf16.mxu0 %v1300_v19  ;;  %v310_v19 = vld [vmem:[%s1729_s13 + $0x100] sm:$0xff] }
  0x8a   : > { %559 = vmatpush1.bf16.msra.mxu0 %v1302_v20  ;;  %v312_v20 = vld [vmem:[%s1729_s13 + $0x110] sm:$0xff] }
  0x8b   : > { %560 = vmatprep.subr.bf16.mxu0 %v1303_v21  ;;  %v315_v21 = vld [vmem:[%s1729_s13 + $0x128] sm:$0xff] }
  0x8e   : > { %561 = vmatpush1.bf16.msra.mxu0 %v1305_v22  ;;  %v317_v22 = vld [vmem:[%s1729_s13 + $0x138] sm:$0xff] }
  0x8f   : > { %562 = vmatprep.subr.bf16.mxu0 %v1306_v23  ;;  %v334_v23 = vpack.c.bf16 %v312_v20, %v310_v19 }
  0x92   : > { %563 = vmatpush1.bf16.msra.mxu0 %v1308_v24  ;;  %v337_v24 = vpack.c.bf16 %v317_v22, %v315_v21 }
  0x93   : > { %564 = vmatprep.subr.bf16.mxu0 %v1309_v25  ;;  %v314_v25 = vld [vmem:[%s1729_s13 + $0x120] sm:$0xff] }
  0x96   : > { %565 = vmatpush1.bf16.msra.mxu0 %v1311_v26  ;;  %v316_v26 = vld [vmem:[%s1729_s13 + $0x130] sm:$0xff] }
  0x97   : > { %566 = vmatprep.subr.bf16.mxu0 %v1312_v27  ;;  %v336_v27 = vpack.c.bf16 %v316_v26, %v314_v25 }
  0x9a   : > { %567 = vmatpush1.bf16.msra.mxu0 %v1314_v28  ;;  %v1324_v28 = vld [vmem:[#allocation6] sm:$0xff]  }
  0x9b   : > { %568 = vmatprep.subr.bf16.mxu0 %v1315_v29  ;;  %1172 = vmatprep.subr.bf16.mxu1 %v1324_v28  ;;  %v1325_v29 = vld [vmem:[#allocation6 + $0x8] sm:$0xff]  }
  0x9c   : > { %1173 = vmatpush3.bf16.msra.mxu1 %v1324_v28 }
  0x9d   : > { %1174 = vmatprep.subr.bf16.mxu1 %v1325_v29 }
  0x9e   : > { %569 = vmatpush1.bf16.msra.mxu0 %v1317_v30  ;;  %v1326_v30 = vld [vmem:[#allocation6 + $0x10] sm:$0xff]  }
  0x9f   : > { %570 = vmatprep.subr.bf16.mxu0 %v1318_v31  ;;  %v1327_v31 = vld [vmem:[#allocation6 + $0x18] sm:$0xff]  }
  0xa0   : > { %1175 = vmatpush3.bf16.msra.mxu1 %v1325_v29 }
  0xa1   : > { %1176 = vmatprep.subr.bf16.mxu1 %v1326_v30 }
  0xa2   : > { %571 = vmatpush1.bf16.msra.mxu0 %v1320_v32  ;;  %v1328_v32 = vld [vmem:[#allocation6 + $0x20] sm:$0xff]  }
  0xa3   : > { %572 = vmatprep.subr.bf16.mxu0 %v1321_v33  ;;  %v1329_v33 = vld [vmem:[#allocation6 + $0x28] sm:$0xff]  }
  0xa4   : > { %1177 = vmatpush3.bf16.msra.mxu1 %v1326_v30 }
  0xa5   : > { %1178 = vmatprep.subr.bf16.mxu1 %v1327_v31 }
  0xa6   : > { %573 = vmatpush1.bf16.msra.mxu0 %v1323_v34  ;;  %v1330_v34 = vld [vmem:[#allocation6 + $0x30] sm:$0xff]  }
  0xa8   : > { %1179 = vmatpush3.bf16.msra.mxu1 %v1327_v31 }
  0xa9   : > { %575 = vmatmul.mubr.bf16.vlgmr.msra.gmra.mrb[0].mxu0 %v318_v39  ;;  %1180 = vmatprep.subr.bf16.mxu1 %v1328_v32  ;;  %v370_v39 = vld [vmem:[%s1891_s2] sm:$0x3] }
  0xaa   : > { %584 = vmatprep.mubr.bf16.mxu0 %v321_v40  ;;  %v374_v40 = vsub.s32 0, %v373_v37  ;;  %v1782_v41 = vrot.slane %v370_v39, %v378_v38 }
  0xac   : > { %1181 = vmatpush3.bf16.msra.mxu1 %v1328_v32  ;;  %v1784_v44 = vrot.slane %v370_v39, %v374_v40 }
  0xad   : > { %1182 = vmatprep.subr.bf16.mxu1 %v1329_v33 }
  0xb0   : > { %1183 = vmatpush3.bf16.msra.mxu1 %v1329_v33 }
  0xb1   : > { %585 = vmatmul.mubr.bf16.gmra.mrb[4].mxu0 %v320_v45  ;;  %1184 = vmatprep.subr.bf16.mxu1 %v1330_v34 }
  0xb2   : > { %594 = vmatprep.mubr.bf16.mxu0 %v323_v46 }
  0xb4   : > { %1185 = vmatpush3.bf16.msra.mxu1 %v1330_v34 }
  0xb5   : > { %1186 = vmatprep.subr.bf16.mxu1 %v1331_v35 }
  0xb8   : > { %1187 = vmatpush3.bf16.msra.mxu1 %v1331_v35 }
  0xb9   : > { %595 = vmatmul.mubr.bf16.gmra.mrb[8].mxu0 %v322_v51 }
  0xba   : > { %604 = vmatprep.mubr.bf16.mxu0 %v325_v52 }
  0xc1   : > { %605 = vmatmul.mubr.bf16.gmra.mrb[12].mxu0 %v324_v57 }
  0xc2   : > { %614 = vmatprep.mubr.bf16.mxu0 %v327_v58 }
  0xc9   : > { %615 = vmatmul.mubr.bf16.gmra.mrb[16].mxu0 %v326_v63 }
  0xca   : > { %624 = vmatprep.mubr.bf16.mxu0 %v329_v0 }
  0xd1   : > { %625 = vmatmul.mubr.bf16.gmra.mrb[20].mxu0 %v328_v5 }
  0xd2   : > { %634 = vmatprep.mubr.bf16.mxu0 %v331_v6 }
  0xd9   : > { %635 = vmatmul.mubr.bf16.gmra.mrb[24].mxu0 %v330_v11 }
  0xda   : > { %644 = vmatprep.mubr.bf16.mxu0 %v333_v12 }
  0xe1   : > { %645 = vmatmul.mubr.bf16.gmra.mrb[28].mxu0 %v332_v17 }
  0xe2   : > { %654 = vmatprep.mubr.bf16.mxu0 %v335_v18 }
  0xe9   : > { %655 = vmatmul.mubr.bf16.gmra.mrb[32].mxu0 %v334_v23 }
  0xea   : > { %664 = vmatprep.mubr.bf16.mxu0 %v337_v24 }
  0xf1   : > { %665 = vmatmul.mubr.bf16.gmra.mrb[36].mxu0 %v336_v27 }
 0x17c   : > { %v576_v42 = vpop.f32.mrb[0].mxu0 }
 0x17d   : > { %v578_v43 = vpop.f32.mrb[1].mxu0  ;;  %v577_v50 = vadd.f32 %v576_v42, %v1784_v44 }
 0x17e   : > { %v579_v45 = vadd.f32 %v578_v43, %v1782_v41  ;;  %v580_v46 = vpop.f32.mrb[2].mxu0 }
 0x17f   : > { %v582_v47 = vpop.f32.mrb[3].mxu0  ;;  %v581_v52 = vadd.f32 %v580_v46, %v1784_v44 }
 0x180   : > { %v695_v48 = vmul.f32 0.5, %v579_v45  ;;  %v583_v49 = vadd.f32 %v582_v47, %v1782_v41 }
 0x182   : > { %1332 = vtanh.f32 %v695_v48  ;;  %v696_v51 = vmul.f32 0.5, %v583_v49 }
 0x184   : > { %1334 = vtanh.f32 %v696_v51  ;;  %v586_v53 = vpop.f32.mrb[4].mxu0 }
 0x185   : > { %v588_v54 = vpop.f32.mrb[5].mxu0  ;;  %1336 = vtanh.f32 %v577_v50  ;;  %v587_v60 = vadd.f32 %v586_v53, %v1784_v44 }
 0x186   : > { %v589_v55 = vadd.f32 %v588_v54, %v1782_v41  ;;  %v590_v56 = vpop.f32.mrb[6].mxu0  ;;  %1338 = vtanh.f32 %v581_v52 }
 0x187   : > { %v592_v57 = vpop.f32.mrb[7].mxu0  ;;  %v591_v63 = vadd.f32 %v590_v56, %v1784_v44 }
 0x188   : > { %v697_v58 = vmul.f32 0.5, %v589_v55  ;;  %v593_v59 = vadd.f32 %v592_v57, %v1782_v41 }
 0x18a   : > { %1340 = vtanh.f32 %v697_v58  ;;  %v698_v61 = vmul.f32 0.5, %v593_v59 }
 0x18c   : > { %v1333_v62 = vpop.eup %1332  ;;  %1342 = vtanh.f32 %v698_v61  ;;  %v596_v0 = vpop.f32.mrb[8].mxu0 }
 0x18d   : > { %v735_v1 = vadd.f32 1.0, %v1333_v62  ;;  %v598_v2 = vpop.f32.mrb[9].mxu0  ;;  %1344 = vtanh.f32 %v587_v60  ;;  %v597_v15 = vadd.f32 %v596_v0, %v1784_v44 }
 0x18e   : > { %v1335_v3 = vpop.eup %1334  ;;  %v599_v4 = vadd.f32 %v598_v2, %v1782_v41  ;;  %v600_v5 = vpop.f32.mrb[10].mxu0  ;;  %1346 = vtanh.f32 %v591_v63 }
 0x18f   : > { %v736_v6 = vadd.f32 1.0, %v1335_v3  ;;  %v602_v7 = vpop.f32.mrb[11].mxu0  ;;  %v755_v8 = vmul.f32 0.5, %v735_v1  ;;  %v1337_v9 = vpop.eup %1336  ;;  %v601_v19 = vadd.f32 %v600_v5, %v1784_v44 }
 0x190   : > { %v699_v10 = vmul.f32 0.5, %v599_v4  ;;  %v603_v11 = vadd.f32 %v602_v7, %v1782_v41  ;;  %v1339_v14 = vpop.eup %1338 }
 0x191   : > { %v756_v12 = vmul.f32 0.5, %v736_v6  ;;  %v775_v13 = vmul.f32 %v1337_v9, %v755_v8 }
 0x192   : > { %1348 = vtanh.f32 %v699_v10  ;;  %v700_v16 = vmul.f32 0.5, %v603_v11 }
 0x193   : > { %v776_v17 = vmul.f32 %v1339_v14, %v756_v12 }
 0x194   : > { %v1341_v18 = vpop.eup %1340  ;;  %1350 = vtanh.f32 %v700_v16  ;;  %v606_v20 = vpop.f32.mrb[12].mxu0 }
 0x195   : > { %v737_v21 = vadd.f32 1.0, %v1341_v18  ;;  %v608_v22 = vpop.f32.mrb[13].mxu0  ;;  %v795_v23 = vpack.c.bf16 %v776_v17, %v775_v13  ;;  %1352 = vtanh.f32 %v597_v15  ;;  %v607_v36 = vadd.f32 %v606_v20, %v1784_v44 }
 0x196   : > { %v1343_v24 = vpop.eup %1342  ;;  %v609_v25 = vadd.f32 %v608_v22, %v1782_v41  ;;  %v610_v26 = vpop.f32.mrb[14].mxu0  ;;  %1354 = vtanh.f32 %v601_v19 }
 0x197   : > { %v757_v27 = vmul.f32 0.5, %v737_v21  ;;  %v738_v28 = vadd.f32 1.0, %v1343_v24  ;;  %v612_v29 = vpop.f32.mrb[15].mxu0  ;;  %1188 = vmatprep.mubr.bf16.mxu1 %v795_v23  ;;  %v1345_v30 = vpop.eup %1344  ;;  %v611_v40 = vadd.f32 %v610_v26, %v1784_v44 }
 0x198   : > { %v701_v31 = vmul.f32 0.5, %v609_v25  ;;  %v613_v32 = vadd.f32 %v612_v29, %v1782_v41  ;;  %v1347_v35 = vpop.eup %1346 }
 0x199   : > { %v758_v33 = vmul.f32 0.5, %v738_v28  ;;  %v777_v34 = vmul.f32 %v1345_v30, %v757_v27 }
 0x19a   : > { %1356 = vtanh.f32 %v701_v31  ;;  %v702_v37 = vmul.f32 0.5, %v613_v32 }
 0x19b   : > { %v778_v38 = vmul.f32 %v1347_v35, %v758_v33 }
 0x19c   : > { %v1349_v39 = vpop.eup %1348  ;;  %1358 = vtanh.f32 %v702_v37  ;;  %v616_v42 = vpop.f32.mrb[16].mxu0 }
 0x19d   : > { %v739_v43 = vadd.f32 1.0, %v1349_v39  ;;  %v618_v45 = vpop.f32.mrb[17].mxu0  ;;  %v796_v46 = vpack.c.bf16 %v778_v38, %v777_v34  ;;  %1360 = vtanh.f32 %v607_v36  ;;  %v617_v59 = vadd.f32 %v616_v42, %v1784_v44 }
 0x19e   : > { %v1351_v47 = vpop.eup %1350  ;;  %v619_v48 = vadd.f32 %v618_v45, %v1782_v41  ;;  %v620_v49 = vpop.f32.mrb[18].mxu0  ;;  %1362 = vtanh.f32 %v611_v40 }
 0x19f   : > { %v759_v50 = vmul.f32 0.5, %v739_v43  ;;  %v740_v51 = vadd.f32 1.0, %v1351_v47  ;;  %v622_v52 = vpop.f32.mrb[19].mxu0  ;;  %1189 = vmatmul.mubr.bf16.vlgmr.msra.gmra.mrb[0].mxu1 %v796_v46  ;;  %v1353_v53 = vpop.eup %1352  ;;  %v621_v63 = vadd.f32 %v620_v49, %v1784_v44 }
 0x1a0   : > { %v703_v54 = vmul.f32 0.5, %v619_v48  ;;  %v623_v55 = vadd.f32 %v622_v52, %v1782_v41  ;;  %v1355_v58 = vpop.eup %1354 }
 0x1a1   : > { %v760_v56 = vmul.f32 0.5, %v740_v51  ;;  %v779_v57 = vmul.f32 %v1353_v53, %v759_v50 }
 0x1a2   : > { %1364 = vtanh.f32 %v703_v54  ;;  %v704_v60 = vmul.f32 0.5, %v623_v55 }
 0x1a3   : > { %v780_v61 = vmul.f32 %v1355_v58, %v760_v56 }
 0x1a4   : > { %v1357_v62 = vpop.eup %1356  ;;  %1366 = vtanh.f32 %v704_v60  ;;  %v626_v0 = vpop.f32.mrb[20].mxu0 }
 0x1a5   : > { %v741_v1 = vadd.f32 1.0, %v1357_v62  ;;  %v628_v2 = vpop.f32.mrb[21].mxu0  ;;  %v797_v3 = vpack.c.bf16 %v780_v61, %v779_v57  ;;  %1368 = vtanh.f32 %v617_v59  ;;  %v627_v16 = vadd.f32 %v626_v0, %v1784_v44 }
 0x1a6   : > { %v1359_v4 = vpop.eup %1358  ;;  %v629_v5 = vadd.f32 %v628_v2, %v1782_v41  ;;  %v630_v6 = vpop.f32.mrb[22].mxu0  ;;  %1370 = vtanh.f32 %v621_v63 }
 0x1a7   : > { %v761_v7 = vmul.f32 0.5, %v741_v1  ;;  %v742_v8 = vadd.f32 1.0, %v1359_v4  ;;  %v632_v9 = vpop.f32.mrb[23].mxu0  ;;  %1192 = vmatprep.mubr.bf16.mxu1 %v797_v3  ;;  %v1361_v10 = vpop.eup %1360  ;;  %v631_v20 = vadd.f32 %v630_v6, %v1784_v44 }
 0x1a8   : > { %v705_v11 = vmul.f32 0.5, %v629_v5  ;;  %v633_v12 = vadd.f32 %v632_v9, %v1782_v41  ;;  %v1363_v15 = vpop.eup %1362 }
 0x1a9   : > { %v762_v13 = vmul.f32 0.5, %v742_v8  ;;  %v781_v14 = vmul.f32 %v1361_v10, %v761_v7 }
 0x1aa   : > { %1372 = vtanh.f32 %v705_v11  ;;  %v706_v17 = vmul.f32 0.5, %v633_v12 }
 0x1ab   : > { %v782_v18 = vmul.f32 %v1363_v15, %v762_v13 }
 0x1ac   : > { %v1365_v19 = vpop.eup %1364  ;;  %1374 = vtanh.f32 %v706_v17  ;;  %v636_v21 = vpop.f32.mrb[24].mxu0 }
 0x1ad   : > { %v743_v22 = vadd.f32 1.0, %v1365_v19  ;;  %v638_v23 = vpop.f32.mrb[25].mxu0  ;;  %v798_v24 = vpack.c.bf16 %v782_v18, %v781_v14  ;;  %1376 = vtanh.f32 %v627_v16  ;;  %v637_v37 = vadd.f32 %v636_v21, %v1784_v44 }
 0x1ae   : > { %v1367_v25 = vpop.eup %1366  ;;  %v639_v26 = vadd.f32 %v638_v23, %v1782_v41  ;;  %v640_v27 = vpop.f32.mrb[26].mxu0  ;;  %1378 = vtanh.f32 %v631_v20 }
 0x1af   : > { %v763_v28 = vmul.f32 0.5, %v743_v22  ;;  %v744_v29 = vadd.f32 1.0, %v1367_v25  ;;  %v642_v30 = vpop.f32.mrb[27].mxu0  ;;  %1193 = vmatmul.mubr.bf16.gmra.mrb[4].mxu1 %v798_v24  ;;  %v1369_v31 = vpop.eup %1368  ;;  %v641_v42 = vadd.f32 %v640_v27, %v1784_v44 }
 0x1b0   : > { %v707_v32 = vmul.f32 0.5, %v639_v26  ;;  %v643_v33 = vadd.f32 %v642_v30, %v1782_v41  ;;  %v1371_v36 = vpop.eup %1370 }
 0x1b1   : > { %v764_v34 = vmul.f32 0.5, %v744_v29  ;;  %v783_v35 = vmul.f32 %v1369_v31, %v763_v28 }
 0x1b2   : > { %1380 = vtanh.f32 %v707_v32  ;;  %v708_v38 = vmul.f32 0.5, %v643_v33 }
 0x1b3   : > { %v784_v39 = vmul.f32 %v1371_v36, %v764_v34 }
 0x1b4   : > { %v1373_v40 = vpop.eup %1372  ;;  %1382 = vtanh.f32 %v708_v38  ;;  %v646_v43 = vpop.f32.mrb[28].mxu0 }
 0x1b5   : > { %v745_v45 = vadd.f32 1.0, %v1373_v40  ;;  %v648_v46 = vpop.f32.mrb[29].mxu0  ;;  %v799_v47 = vpack.c.bf16 %v784_v39, %v783_v35  ;;  %1384 = vtanh.f32 %v637_v37  ;;  %v647_v60 = vadd.f32 %v646_v43, %v1784_v44 }
 0x1b6   : > { %v1375_v48 = vpop.eup %1374  ;;  %v649_v49 = vadd.f32 %v648_v46, %v1782_v41  ;;  %v650_v50 = vpop.f32.mrb[30].mxu0  ;;  %1386 = vtanh.f32 %v641_v42 }
 0x1b7   : > { %v765_v51 = vmul.f32 0.5, %v745_v45  ;;  %v746_v52 = vadd.f32 1.0, %v1375_v48  ;;  %v652_v53 = vpop.f32.mrb[31].mxu0  ;;  %1196 = vmatprep.mubr.bf16.mxu1 %v799_v47  ;;  %v1377_v54 = vpop.eup %1376  ;;  %v651_v0 = vadd.f32 %v650_v50, %v1784_v44 }
 0x1b8   : > { %v709_v55 = vmul.f32 0.5, %v649_v49  ;;  %v653_v56 = vadd.f32 %v652_v53, %v1782_v41  ;;  %v1379_v59 = vpop.eup %1378 }
 0x1b9   : > { %v766_v57 = vmul.f32 0.5, %v746_v52  ;;  %v785_v58 = vmul.f32 %v1377_v54, %v765_v51 }
 0x1ba   : > { %1388 = vtanh.f32 %v709_v55  ;;  %v710_v61 = vmul.f32 0.5, %v653_v56 }
 0x1bb   : > { %v786_v62 = vmul.f32 %v1379_v59, %v766_v57 }
 0x1bc   : > { %v1381_v63 = vpop.eup %1380  ;;  %1390 = vtanh.f32 %v710_v61  ;;  %v656_v1 = vpop.f32.mrb[32].mxu0 }
 0x1bd   : > { %v747_v2 = vadd.f32 1.0, %v1381_v63  ;;  %v658_v3 = vpop.f32.mrb[33].mxu0  ;;  %v800_v4 = vpack.c.bf16 %v786_v62, %v785_v58  ;;  %1392 = vtanh.f32 %v647_v60  ;;  %v657_v17 = vadd.f32 %v656_v1, %v1784_v44  ;;  %v1140_v1 = vld [vmem:[%s1893_s4] ss:$0 sm:$0xff] }
 0x1be   : > { %v1383_v5 = vpop.eup %1382  ;;  %v659_v6 = vadd.f32 %v658_v3, %v1782_v41  ;;  %v660_v7 = vpop.f32.mrb[34].mxu0  ;;  %1394 = vtanh.f32 %v651_v0 }
 0x1bf   : > { %v767_v8 = vmul.f32 0.5, %v747_v2  ;;  %v748_v9 = vadd.f32 1.0, %v1383_v5  ;;  %v662_v10 = vpop.f32.mrb[35].mxu0  ;;  %1197 = vmatmul.mubr.bf16.gmra.mrb[8].mxu1 %v800_v4  ;;  %v1385_v11 = vpop.eup %1384  ;;  %v661_v21 = vadd.f32 %v660_v7, %v1784_v44 }
 0x1c0   : > { %v711_v12 = vmul.f32 0.5, %v659_v6  ;;  %v663_v13 = vadd.f32 %v662_v10, %v1782_v41  ;;  %v1387_v16 = vpop.eup %1386 }
 0x1c1   : > { %v768_v14 = vmul.f32 0.5, %v748_v9  ;;  %v787_v15 = vmul.f32 %v1385_v11, %v767_v8 }
 0x1c2   : > { %1396 = vtanh.f32 %v711_v12  ;;  %v712_v18 = vmul.f32 0.5, %v663_v13 }
 0x1c3   : > { %v788_v19 = vmul.f32 %v1387_v16, %v768_v14 }
 0x1c4   : > { %v1389_v20 = vpop.eup %1388  ;;  %1398 = vtanh.f32 %v712_v18  ;;  %v666_v22 = vpop.f32.mrb[36].mxu0 }
 0x1c5   : > { %v749_v23 = vadd.f32 1.0, %v1389_v20  ;;  %v668_v24 = vpop.f32.mrb[37].mxu0  ;;  %v801_v25 = vpack.c.bf16 %v788_v19, %v787_v15  ;;  %1400 = vtanh.f32 %v657_v17  ;;  %v667_v38 = vadd.f32 %v666_v22, %v1784_v44 }
 0x1c6   : > { %v1391_v26 = vpop.eup %1390  ;;  %v669_v27 = vadd.f32 %v668_v24, %v1782_v41  ;;  %v670_v28 = vpop.f32.mrb[38].mxu0  ;;  %1402 = vtanh.f32 %v661_v21 }
 0x1c7   : > { %v769_v29 = vmul.f32 0.5, %v749_v23  ;;  %v750_v30 = vadd.f32 1.0, %v1391_v26  ;;  %v672_v31 = vpop.f32.mrb[39].mxu0  ;;  %1200 = vmatprep.mubr.bf16.mxu1 %v801_v25  ;;  %v1393_v32 = vpop.eup %1392  ;;  %v671_v43 = vadd.f32 %v670_v28, %v1784_v44 }
 0x1c8   : > { %v713_v33 = vmul.f32 0.5, %v669_v27  ;;  %v673_v34 = vadd.f32 %v672_v31, %v1782_v41  ;;  %v1395_v37 = vpop.eup %1394 }
 0x1c9   : > { %v770_v35 = vmul.f32 0.5, %v750_v30  ;;  %v789_v36 = vmul.f32 %v1393_v32, %v769_v29 }
 0x1ca   : > { %1404 = vtanh.f32 %v713_v33  ;;  %v714_v39 = vmul.f32 0.5, %v673_v34 }
 0x1cb   : > { %v790_v40 = vmul.f32 %v1395_v37, %v770_v35 }
 0x1cc   : > { %v1397_v42 = vpop.eup %1396  ;;  %1406 = vtanh.f32 %v714_v39 }
 0x1cd   : > { %v751_v45 = vadd.f32 1.0, %v1397_v42  ;;  %v802_v46 = vpack.c.bf16 %v790_v40, %v789_v36  ;;  %1408 = vtanh.f32 %v667_v38 }
 0x1ce   : > { %v1399_v47 = vpop.eup %1398  ;;  %1410 = vtanh.f32 %v671_v43 }
 0x1cf   : > { %v771_v48 = vmul.f32 0.5, %v751_v45  ;;  %v752_v49 = vadd.f32 1.0, %v1399_v47  ;;  %1201 = vmatmul.mubr.bf16.gmra.mrb[12].mxu1 %v802_v46  ;;  %v1401_v41 = vpop.eup %1400 }
 0x1d0   : > { %v1403_v52 = vpop.eup %1402 }
 0x1d1   : > { %v772_v50 = vmul.f32 0.5, %v752_v49  ;;  %v791_v51 = vmul.f32 %v1401_v41, %v771_v48 }
 0x1d3   : > { %v792_v53 = vmul.f32 %v1403_v52, %v772_v50 }
 0x1d4   : > { %v1405_v54 = vpop.eup %1404 }
 0x1d5   : > { %v753_v55 = vadd.f32 1.0, %v1405_v54  ;;  %v803_v56 = vpack.c.bf16 %v792_v53, %v791_v51 }
 0x1d6   : > { %v1407_v57 = vpop.eup %1406 }
 0x1d7   : > { %v773_v44 = vmul.f32 0.5, %v753_v55  ;;  %v754_v58 = vadd.f32 1.0, %v1407_v57  ;;  %1204 = vmatprep.mubr.bf16.mxu1 %v803_v56  ;;  %v1409_v59 = vpop.eup %1408 }
 0x1d8   : > { %v1411_v62 = vpop.eup %1410 }
 0x1d9   : > { %v774_v60 = vmul.f32 0.5, %v754_v58  ;;  %v793_v61 = vmul.f32 %v1409_v59, %v773_v44 }
 0x1db   : > { %v794_v63 = vmul.f32 %v1411_v62, %v774_v60 }
 0x1dd   : > { %v804_v0 = vpack.c.bf16 %v794_v63, %v793_v61 }
 0x1df   : > { %1205 = vmatmul.mubr.bf16.gmra.mrb[16].mxu1 %v804_v0 }
 0x272   : > { %v1190_v2 = vpop.f32.mrb[0].mxu1 }
 0x273   : > { %v919_v3 = vadd.f32 %v1190_v2, %v1140_v1  ;;  %v910_v4 = vpop.f32.mrb[1].mxu1 }
 0x274   : > { %v911_v5 = vadd.f32 %v1140_v1, %v910_v4  ;;  %v1191_v6 = vpop.f32.mrb[2].mxu1 }
 0x275   : > { %992 = vst.msk [vmem:[%s1834_s16 + $0x10] sm:$0xff] %vm989_vm0, %v919_v3  ;;  %v922_v7 = vadd.f32 %v1191_v6, %v1140_v1  ;;  %v913_v8 = vpop.f32.mrb[3].mxu1 }
 0x276   : > { %990 = vst.msk [vmem:[%s1834_s16] sm:$0xff] %vm989_vm0, %v911_v5  ;;  %v914_v9 = vadd.f32 %v1140_v1, %v913_v8 }
 0x277   : > { %993 = vst.msk [vmem:[%s1834_s16 + $0x18] sm:$0xff] %vm989_vm0, %v922_v7 }
 0x278   : > { %991 = vst.msk [vmem:[%s1834_s16 + $0x8] sm:$0xff] %vm989_vm0, %v914_v9 }
 0x282   : > { %v1194_v10 = vpop.f32.mrb[4].mxu1 }
 0x283   : > { %v935_v11 = vadd.f32 %v1194_v10, %v1140_v1  ;;  %v926_v12 = vpop.f32.mrb[5].mxu1 }
 0x284   : > { %v927_v13 = vadd.f32 %v1140_v1, %v926_v12  ;;  %v1195_v14 = vpop.f32.mrb[6].mxu1 }
 0x285   : > { %996 = vst.msk [vmem:[%s1834_s16 + $0x30] sm:$0xff] %vm989_vm0, %v935_v11  ;;  %v938_v15 = vadd.f32 %v1195_v14, %v1140_v1  ;;  %v929_v16 = vpop.f32.mrb[7].mxu1 }
 0x286   : > { %994 = vst.msk [vmem:[%s1834_s16 + $0x20] sm:$0xff] %vm989_vm0, %v927_v13  ;;  %v930_v17 = vadd.f32 %v1140_v1, %v929_v16 }
 0x287   : > { %997 = vst.msk [vmem:[%s1834_s16 + $0x38] sm:$0xff] %vm989_vm0, %v938_v15 }
 0x288   : > { %995 = vst.msk [vmem:[%s1834_s16 + $0x28] sm:$0xff] %vm989_vm0, %v930_v17 }
 0x292   : > { %v1198_v18 = vpop.f32.mrb[8].mxu1 }
 0x293   : > { %v951_v19 = vadd.f32 %v1198_v18, %v1140_v1  ;;  %v942_v20 = vpop.f32.mrb[9].mxu1 }
 0x294   : > { %v943_v21 = vadd.f32 %v1140_v1, %v942_v20  ;;  %v1199_v22 = vpop.f32.mrb[10].mxu1 }
 0x295   : > { %1000 = vst.msk [vmem:[%s1834_s16 + $0x50] sm:$0xff] %vm989_vm0, %v951_v19  ;;  %v954_v23 = vadd.f32 %v1199_v22, %v1140_v1  ;;  %v945_v24 = vpop.f32.mrb[11].mxu1 }
 0x296   : > { %998 = vst.msk [vmem:[%s1834_s16 + $0x40] sm:$0xff] %vm989_vm0, %v943_v21  ;;  %v946_v25 = vadd.f32 %v1140_v1, %v945_v24 }
 0x297   : > { %1001 = vst.msk [vmem:[%s1834_s16 + $0x58] sm:$0xff] %vm989_vm0, %v954_v23 }
 0x298   : > { %999 = vst.msk [vmem:[%s1834_s16 + $0x48] sm:$0xff] %vm989_vm0, %v946_v25 }
 0x2a2   : > { %v1202_v26 = vpop.f32.mrb[12].mxu1 }
 0x2a3   : > { %v967_v27 = vadd.f32 %v1202_v26, %v1140_v1  ;;  %v958_v28 = vpop.f32.mrb[13].mxu1 }
 0x2a4   : > { %v959_v29 = vadd.f32 %v1140_v1, %v958_v28  ;;  %v1203_v30 = vpop.f32.mrb[14].mxu1 }
 0x2a5   : > { %1004 = vst.msk [vmem:[%s1834_s16 + $0x70] sm:$0xff] %vm989_vm0, %v967_v27  ;;  %v970_v31 = vadd.f32 %v1203_v30, %v1140_v1  ;;  %v961_v32 = vpop.f32.mrb[15].mxu1 }
 0x2a6   : > { %1002 = vst.msk [vmem:[%s1834_s16 + $0x60] sm:$0xff] %vm989_vm0, %v959_v29  ;;  %v962_v33 = vadd.f32 %v1140_v1, %v961_v32 }
 0x2a7   : > { %1005 = vst.msk [vmem:[%s1834_s16 + $0x78] sm:$0xff] %vm989_vm0, %v970_v31 }
 0x2a8   : > { %1003 = vst.msk [vmem:[%s1834_s16 + $0x68] sm:$0xff] %vm989_vm0, %v962_v33 }
 0x2b2   : > { %v1206_v34 = vpop.f32.mrb[16].mxu1 }
 0x2b3   : > { %v983_v35 = vadd.f32 %v1206_v34, %v1140_v1  ;;  %v974_v36 = vpop.f32.mrb[17].mxu1 }
 0x2b4   : > { %v975_v37 = vadd.f32 %v1140_v1, %v974_v36  ;;  %v1207_v38 = vpop.f32.mrb[18].mxu1 }
 0x2b5   : > { %1008 = vst.msk [vmem:[%s1834_s16 + $0x90] sm:$0xff] %vm989_vm0, %v983_v35  ;;  %v986_v39 = vadd.f32 %v1207_v38, %v1140_v1  ;;  %v977_v40 = vpop.f32.mrb[19].mxu1 }
 0x2b6   : > { %1006 = vst.msk [vmem:[%s1834_s16 + $0x80] sm:$0xff] %vm989_vm0, %v975_v37  ;;  %v978_v42 = vadd.f32 %v1140_v1, %v977_v40 }
 0x2b7   : > { %1009 = vst.msk [vmem:[%s1834_s16 + $0x98] sm:$0xff] %vm989_vm0, %v986_v39 }
 0x2b8   : > { %1007 = vst.msk [vmem:[%s1834_s16 + $0x88] sm:$0xff] %vm989_vm0, %v978_v42 }
 0x2b9 PF: > { %p16_p6 = scmp.ge.s32.totalorder %s1673_s14, 4   ;;  %s1907_s18 = smov %s1528_s19 }
 0x2ba   : > { %s1908_s19 = smov %s1532_s20  ;;  %s1909_s20 = smov %s1682_s17 }
 0x2bb   : > { %s1910_s21 = smov %s1673_s14  ;;  %18 = sbr.rel (!%p16_p6) target bundleno = 4 (0x4), region = 88 }
 0x2c2   :  { %1032 = vsyncpa [#allocation3], 1 }
 0x2c3   :  { %1034 = vsyncpa [#allocation3 + $0x1], 1 }
 0x2c4   :  { %1035 = vsyncpa [#allocation5], 1 }

// kernel: tpu_custom_call.1
= control target key start
LH: loop header
LB: loop body
LE: loop exit
PB: predicated region body
PF: predicated region fallthrough
CT: control target
= control target key end

     0   :  { %10 = vsyncpa [#allocation3], 0  ;;  %s1889_s0 = inlined_call_operand.hbm [shape: f32[320,256], index: 0, kind: input, shape index: {}]   ;;  %s1890_s1 = inlined_call_operand.hbm [shape: bf16[256,256], index: 1, kind: input, shape index: {}]   ;;  %s1891_s2 = inlined_call_operand.vmem [shape: f32[1,256], index: 2, kind: input, shape index: {}]   ;;  %s1892_s3 = inlined_call_operand.hbm [shape: bf16[128,128], index: 3, kind: input, shape index: {}]   ;;  %s1893_s4 = inlined_call_operand.vmem [shape: f32[1,128], index: 4, kind: input, shape index: {}]   ;;  %s1894_s5 = inlined_call_operand.vmem [shape: f32[320,1], index: 5, kind: output, shape index: {}]  }
   0x1   :  { %12 = vsyncpa [#allocation3 + $0x1], 0 }
   0x2   :  { %13 = vsyncpa [#allocation5], 0  ;;  %s1577_s18 = smov 0   ;;  %s1579_s19 = smov 0  }
   0x3   :  { %s1581_s20 = smov 0   ;;  %s1583_s21 = smov 0  }
   0x4 LB: > { %s1096_s22 = sadd.s32 4294967295, %s1536_s21   ;;  %p39_p0 = scmp.ne.s32.totalorder %s1528_s19, %s1524_s18  ;;  %s1536_s21 = sphi %s1583_s21, %s1910_s21   ;;  %s1532_s20 = sphi %s1581_s20, %s1909_s20   ;;  %s1528_s19 = sphi %s1579_s19, %s1908_s19   ;;  %s1524_s18 = sphi %s1577_s18, %s1907_s18  }
   0x5   : > { %p1599_p1 = scmp.eq.s32.totalorder %s1096_s22, 0  ;;  %p1098_p2 = scmp.ge.s32.totalorder %s1536_s21, 1 }
   0x6   : > { %p160_p3 = scmp.lt.s32.totalorder %s1536_s21, 3  ;;  %s1538_s26 = smov [#allocation4]  }
   0x7   : > { %s1899_s23 = scalar_select %p1599_p1, 1, 0 }
   0x8   : > { %p1607_p4 = por %p1599_p1, %p39_p0  ;;  %p1611_p5 = pnand %p1098_p2, %p160_p3 }
   0x9   : > { %s172_s27 = sshll.u32 %s1538_s26, 4  ;;  %s1539_s29 = smov [#allocation6]   ;;  %s173_s27 = int_to_ptr.vmem [resolvable:$true] %s172_s27 }
   0xa   : > { %s1900_s24 = scalar_select %p1607_p4, 1, 0 }
   0xb   : > { %s1901_s25 = scalar_select %p1611_p5, 1, 0 }
   0xc   : > { %p1220_p6 = pneg %p1611_p5  ;;  %s188_s30 = sshll.u32 %s1539_s29, 4  ;;  %s1623_s30 = int_to_ptr.vmem [resolvable:$true] %s188_s30 }
   0xd   : > { %s1412_s8 = scalar_lea.hbm %s1890_s1, 4096 }
   0xe   : > { %p1619_p7 = pnand %p1220_p6, %p1599_p1  ;;  %p1413_p8 = scmp.ne.s32.totalorder %s1890_s1, %s1412_s8 }
   0xf   : > { %p1419_p12 = scmp.lt.u32.totalorder %s1412_s8, %s1890_s1 }
  0x10   : > { %p1414_p9 = pneg %p1619_p7 }
  0x12   : > { %p1415_p10 = pnand %p1414_p9, %p1413_p8 }
  0x14   : > { %p1416_p11 = pneg %p1415_p10 }
  0x16   : > { %p1421_p13 = pnand %p1419_p12, %p1416_p11 }
  0x18   : > { %1424 = shalt.err (!%p1421_p13)
}
  0x19   : > { %s1425_s13 = scalar_lea.vmem %s173_s27, 4096  ;;  %p1433_p6 = scmp.lt.s32.totalorder %s173_s27, %s173_s27 }
  0x1a   : > { %p1426_p0 = scmp.ne.s32.totalorder %s173_s27, %s1425_s13  ;;  %p1434_p1 = scmp.lt.s32.totalorder %s1425_s13, %s1425_s13 }
  0x1c   : > { %p1428_p2 = pnand %p1426_p0, %p1414_p9  ;;  %p1435_p4 = por %p1434_p1, %p1433_p6 }
  0x1e   : > { %p1429_p3 = pneg %p1428_p2 }
  0x20   : > { %p1436_p5 = pnand %p1435_p4, %p1429_p3 }
  0x22   : > { %1439 = shalt.err (!%p1436_p5)
}
  0x23   : > { %s1540_s14 = smov 128   ;;  %s1541_s15 = smov 8  }
  0x24   : > { %1223 = dma.hbm_to_vmem [thread:$0]  (!%p1619_p7), %s1890_s1, 4096, %s173_s27, [#allocation5], %s1540_s14, %s1540_s14, %s1541_s15  }
  0x25   : > { %s1440_s29 = scalar_lea.hbm %s1892_s3, 1024 }
  0x26   : > { %p1441_p8 = scmp.ne.s32.totalorder %s1892_s3, %s1440_s29  ;;  %p1447_p5 = scmp.lt.u32.totalorder %s1440_s29, %s1892_s3 }
  0x28   : > { %p1443_p1 = pnand %p1441_p8, %p1414_p9 }
  0x2a   : > { %p1444_p4 = pneg %p1443_p1 }
  0x2c   : > { %p1449_p10 = pnand %p1447_p5, %p1444_p4 }
  0x2e   : > { %1452 = shalt.err (!%p1449_p10)
}
  0x2f   : > { %s1453_s27 = scalar_lea.vmem %s1623_s30, 1024  ;;  %p1461_p0 = scmp.lt.s32.totalorder %s1623_s30, %s1623_s30 }
  0x30   : > { %p1454_p11 = scmp.ne.s32.totalorder %s1623_s30, %s1453_s27  ;;  %p1462_p2 = scmp.lt.s32.totalorder %s1453_s27, %s1453_s27 }
  0x32   : > { %p1456_p12 = pnand %p1454_p11, %p1414_p9  ;;  %p1463_p3 = por %p1462_p2, %p1461_p0 }
  0x34   : > { %p1457_p13 = pneg %p1456_p12 }
  0x36   : > { %p1464_p6 = pnand %p1463_p3, %p1457_p13 }
  0x38   : > { %1467 = shalt.err (!%p1464_p6)
}
  0x39   : > { %s1542_s10 = smov 64   ;;  %s1543_s11 = smov 4  }
  0x3a   : > { %1226 = dma.hbm_to_vmem [thread:$0]  (!%p1619_p7), %s1892_s3, 1024, %s1623_s30, [#allocation5], %s1542_s10, %s1542_s10, %s1543_s11  }
  0x3b   : > { %s1673_s14 = sadd.s32 1, %s1536_s21   ;;  %s26_s16 = sadd.s32 1, %s1532_s20 }
  0x3c   : > { %s23_s15 = ssub.s32 %s1536_s21, %s1673_s14  ;;  %p33_p8 = scmp.ne.s32.totalorder %s1532_s20, %s1528_s19 }
  0x3d   : > { %p24_p9 = scmp.eq.s32.totalorder %s23_s15, 0  ;;  %p34_p1 = scmp.eq.s32.totalorder %s1536_s21, 0 }
  0x3e   : > { %p1233_p5 = scmp.lt.s32.totalorder %s1536_s21, 2  ;;  %s205_s18 = sand.u32 1, %s1532_s20  }
  0x3f   : > { %s1682_s17 = scalar_select %p24_p9, %s1532_s20, %s26_s16  }
  0x40   : > { %p35_p4 = por %p34_p1, %p33_p8  ;;  %s1153_s26 = smul.u32 5120, %s1536_s21 }
  0x41   : > { %s1208_s29 = smul.u32 320, %s205_s18  ;;  %s1698_s27 = scalar_lea.sflag [#allocation3], %s205_s18 }
  0x42   : > { %s1690_s7 = scalar_lea.hbm %s1889_s0, %s1153_s26  ;;  %p1692_p7 = pnand %p1233_p5, %p35_p4 }
  0x43   : > { %s209_s8 = scalar_lea.vmem [#allocation2], %s1208_s29  ;;  %s1468_s10 = scalar_lea.hbm %s1690_s7, 5120 }
  0x44   : > { %s217_s9 = sshll.u32 %s209_s8, 4  ;;  %p1469_p10 = scmp.ne.s32.totalorder %s1690_s7, %s1468_s10  ;;  %s1696_s9 = int_to_ptr.vmem [resolvable:$true] %s217_s9 }
  0x45   : > { %p1470_p11 = pneg %p1692_p7  ;;  %s1473_s13 = scalar_lea.hbm %s1889_s0, 10240 }
  0x46   : > { %p1474_p0 = scmp.lt.u32.totalorder %s1690_s7, %s1889_s0  ;;  %p1475_p2 = scmp.lt.u32.totalorder %s1473_s13, %s1468_s10 }
  0x47   : > { %p1471_p12 = pnand %p1470_p11, %p1469_p10  ;;  %p1477_p6 = scmp.lt.u32.totalorder %s1468_s10, %s1690_s7 }
  0x48   : > { %p1476_p3 = por %p1475_p2, %p1474_p0 }
  0x49   : > { %p1472_p13 = pneg %p1471_p12 }
  0x4a   : > { %p1478_p9 = por %p1477_p6, %p1476_p3 }
  0x4c   : > { %p1479_p8 = pnand %p1478_p9, %p1472_p13 }
  0x4e   : > { %1482 = shalt.err (!%p1479_p8)
}
  0x4f   : > { %s1483_s18 = scalar_lea.vmem %s1696_s9, 5120  ;;  %s1544_s26 = smov [#allocation2]  }
  0x50   : > { %p1484_p1 = scmp.ne.s32.totalorder %s1696_s9, %s1483_s18  ;;  %s1488_s29 = sshll.u32 %s1544_s26, 4  ;;  %s1489_s29 = int_to_ptr.vmem [resolvable:$false] %s1488_s29 }
  0x51   : > { %s1490_s28 = scalar_lea.vmem %s1489_s29, 10240  ;;  %p1491_p10 = scmp.lt.s32.totalorder %s1696_s9, %s1489_s29 }
  0x52   : > { %p1486_p4 = pnand %p1484_p1, %p1470_p11  ;;  %p1492_p12 = scmp.lt.s32.totalorder %s1490_s28, %s1483_s18 }
  0x54   : > { %p1487_p5 = pneg %p1486_p4  ;;  %p1493_p0 = por %p1492_p12, %p1491_p10 }
  0x56   : > { %p1494_p2 = pnand %p1493_p0, %p1487_p5 }
  0x58   : > { %1497 = shalt.err (!%p1494_p2)
}
  0x59   : > { %s1545_s6 = smov 256   ;;  %s1546_s8 = smov 16  }
  0x5a   : > { %1230 = dma.hbm_to_vmem [thread:$0]  (!%p1692_p7), %s1690_s7, 5120, %s1696_s9, %s1698_s27, %s1545_s6, %s1545_s6, %s1546_s8  }
  0x5b   : > { %p1904_p11 = scmp.ne.s32.totalorder %s1901_s25, 0 }
  0x5c   : > { %s231_s10 = sand.u32 (!%p1904_p11), 1, %s1528_s19   ;;  %p1905_p13 = scmp.ne.s32.totalorder (!%p1904_p11), %s1900_s24, 0 }
  0x5d   : > { %229 = sbr.rel (%p1904_p11) target bundleno = 697 (0x2b9), region = 40  ;;  %s232_s12 = scalar_lea.sflag (!%p1904_p11), [#allocation3], %s231_s10 }
  0x5e   : > { %s1209_s11 = smul.u32 (!%p1904_p11), 320, %s231_s10 }
  0x60   : > { %s1729_s13 = scalar_lea.vmem (!%p1904_p11), [#allocation2], %s1209_s11 }
  0x64   : > { %1515 = dma.done.wait (%p1905_p13), %s232_s12, 5120  }
  0x65   : > { %1517 = vsyncadd (%p1905_p13), %s232_s12, 4294962176  ;;  %p1906_p3 = scmp.ne.s32.totalorder %s1899_s23, 0 }
  0x67   : > { %1519 = dma.done.wait (%p1906_p3), [#allocation5], 5120  }
  0x68   : > { %1521 = vsyncadd (%p1906_p3), [#allocation5], 4294962176  ;;  %v1276_v0 = vld [vmem:[#allocation4 + $0x4] ss:$8 sps:$4 sm:$0xff]   ;;  %v1278_v1 = vld [vmem:[#allocation4] ss:$8 sps:$4 sm:$0xff]  }
  0x69   : > { %542 = vmatprep.subr.bf16.mxu0 %v1276_v0  ;;  %v1279_v2 = vld [vmem:[#allocation4 + $0x14] ss:$8 sps:$4 sm:$0xff]   ;;  %v1281_v3 = vld [vmem:[#allocation4 + $0x10] ss:$8 sps:$4 sm:$0xff]   ;;  %v1282_v4 = vld [vmem:[#allocation4 + $0x24] ss:$8 sps:$4 sm:$0xff]  }
  0x6a   : > { %543 = vmatpush1.bf16.msra.mxu0 %v1278_v1  ;;  %v1284_v5 = vld [vmem:[#allocation4 + $0x20] ss:$8 sps:$4 sm:$0xff]   ;;  %v1285_v6 = vld [vmem:[#allocation4 + $0x34] ss:$8 sps:$4 sm:$0xff]   ;;  %v1287_v7 = vld [vmem:[#allocation4 + $0x30] ss:$8 sps:$4 sm:$0xff]  }
  0x6b   : > { %544 = vmatprep.subr.bf16.mxu0 %v1279_v2  ;;  %v1288_v8 = vld [vmem:[#allocation4 + $0x44] ss:$8 sps:$4 sm:$0xff]   ;;  %v1290_v9 = vld [vmem:[#allocation4 + $0x40] ss:$8 sps:$4 sm:$0xff]   ;;  %v1291_v10 = vld [vmem:[#allocation4 + $0x54] ss:$8 sps:$4 sm:$0xff]  }
  0x6c   : > { %v1293_v11 = vld [vmem:[#allocation4 + $0x50] ss:$8 sps:$4 sm:$0xff]   ;;  %v1294_v12 = vld [vmem:[#allocation4 + $0x64] ss:$8 sps:$4 sm:$0xff]   ;;  %v1296_v16 = vld [vmem:[#allocation4 + $0x60] ss:$8 sps:$4 sm:$0xff]  }
  0x6d   : > { %v279_v13 = vld [vmem:[%s1729_s13 + $0x8] sm:$0xff]  ;;  %v281_v14 = vld [vmem:[%s1729_s13 + $0x18] sm:$0xff]  ;;  %v278_v35 = vld [vmem:[%s1729_s13] sm:$0xff]  ;;  %s271_s25 = smul.u32 20, %s1096_s22  ;;  %vm989_vm0 = vcmask 7168  }
  0x6e   : > { %545 = vmatpush1.bf16.msra.mxu0 %v1281_v3  ;;  %v319_v15 = vpack.c.bf16 %v281_v14, %v279_v13  ;;  %v1297_v17 = vld [vmem:[#allocation4 + $0x74] ss:$8 sps:$4 sm:$0xff]   ;;  %v1299_v18 = vld [vmem:[#allocation4 + $0x70] ss:$8 sps:$4 sm:$0xff]   ;;  %v1300_v19 = vld [vmem:[#allocation4 + $0x84] ss:$8 sps:$4 sm:$0xff]  }
  0x6f   : > { %546 = vmatprep.subr.bf16.mxu0 %v1282_v4  ;;  %v1302_v20 = vld [vmem:[#allocation4 + $0x80] ss:$8 sps:$4 sm:$0xff]   ;;  %v1303_v21 = vld [vmem:[#allocation4 + $0x94] ss:$8 sps:$4 sm:$0xff]   ;;  %v1305_v22 = vld [vmem:[#allocation4 + $0x90] ss:$8 sps:$4 sm:$0xff]  }
  0x70   : > { %574 = vmatprep.mubr.bf16.mxu0 %v319_v15  ;;  %v1306_v23 = vld [vmem:[#allocation4 + $0xa4] ss:$8 sps:$4 sm:$0xff]   ;;  %v1308_v24 = vld [vmem:[#allocation4 + $0xa0] ss:$8 sps:$4 sm:$0xff]   ;;  %v1309_v25 = vld [vmem:[#allocation4 + $0xb4] ss:$8 sps:$4 sm:$0xff]  }
  0x71   : > { %v1311_v26 = vld [vmem:[#allocation4 + $0xb0] ss:$8 sps:$4 sm:$0xff]   ;;  %v1312_v27 = vld [vmem:[#allocation4 + $0xc4] ss:$8 sps:$4 sm:$0xff]   ;;  %v1314_v28 = vld [vmem:[#allocation4 + $0xc0] ss:$8 sps:$4 sm:$0xff]  }
  0x72   : > { %547 = vmatpush1.bf16.msra.mxu0 %v1284_v5  ;;  %v1315_v29 = vld [vmem:[#allocation4 + $0xd4] ss:$8 sps:$4 sm:$0xff]   ;;  %v1317_v30 = vld [vmem:[#allocation4 + $0xd0] ss:$8 sps:$4 sm:$0xff]   ;;  %v1318_v31 = vld [vmem:[#allocation4 + $0xe4] ss:$8 sps:$4 sm:$0xff]  }
  0x73   : > { %548 = vmatprep.subr.bf16.mxu0 %v1285_v6  ;;  %v1320_v32 = vld [vmem:[#allocation4 + $0xe0] ss:$8 sps:$4 sm:$0xff]   ;;  %v1321_v33 = vld [vmem:[#allocation4 + $0xf4] ss:$8 sps:$4 sm:$0xff]   ;;  %v1323_v34 = vld [vmem:[#allocation4 + $0xf0] ss:$8 sps:$4 sm:$0xff]  }
  0x74   : > { %v280_v36 = vld [vmem:[%s1729_s13 + $0x10] sm:$0xff]  ;;  %v283_v37 = vld [vmem:[%s1729_s13 + $0x28] sm:$0xff]  ;;  %v285_v38 = vld [vmem:[%s1729_s13 + $0x38] sm:$0xff]  ;;  %p272_p7 = scmp.lt.s32.totalorder %s271_s25, 39 }
  0x75   : > { %v318_v39 = vpack.c.bf16 %v280_v36, %v278_v35  ;;  %v321_v40 = vpack.c.bf16 %v285_v38, %v283_v37  ;;  %v282_v41 = vld [vmem:[%s1729_s13 + $0x20] sm:$0xff]  ;;  %v284_v42 = vld [vmem:[%s1729_s13 + $0x30] sm:$0xff]  ;;  %v287_v43 = vld [vmem:[%s1729_s13 + $0x48] sm:$0xff]  ;;  %v372_v36 = vlaneseq }
  0x76   : > { %549 = vmatpush1.bf16.msra.mxu0 %v1287_v7  ;;  %v289_v44 = vld [vmem:[%s1729_s13 + $0x58] sm:$0xff]  ;;  %v320_v45 = vpack.c.bf16 %v284_v42, %v282_v41  ;;  %v286_v47 = vld [vmem:[%s1729_s13 + $0x40] sm:$0xff]  ;;  %v288_v48 = vld [vmem:[%s1729_s13 + $0x50] sm:$0xff]  ;;  %s1912_s25 = smov (!%p272_p7, %s271_s25), 39 }
  0x77   : > { %550 = vmatprep.subr.bf16.mxu0 %v1288_v8  ;;  %v323_v46 = vpack.c.bf16 %v289_v44, %v287_v43  ;;  %v291_v49 = vld [vmem:[%s1729_s13 + $0x68] sm:$0xff]  ;;  %v293_v50 = vld [vmem:[%s1729_s13 + $0x78] sm:$0xff]  ;;  %v322_v51 = vpack.c.bf16 %v288_v48, %v286_v47  ;;  %v290_v53 = vld [vmem:[%s1729_s13 + $0x60] sm:$0xff]  ;;  %v373_v37 = vshrl.u32 %v372_v36, 7  ;;  %s1107_s7 = sshll.u32 %s1912_s25, 3 }
  0x78   : > { %v325_v52 = vpack.c.bf16 %v293_v50, %v291_v49  ;;  %v292_v54 = vld [vmem:[%s1729_s13 + $0x70] sm:$0xff]  ;;  %v295_v55 = vld [vmem:[%s1729_s13 + $0x88] sm:$0xff]  ;;  %v297_v56 = vld [vmem:[%s1729_s13 + $0x98] sm:$0xff]  ;;  %s1834_s16 = scalar_lea.vmem %s1894_s5, %s1107_s7 }
  0x79   : > { %v324_v57 = vpack.c.bf16 %v292_v54, %v290_v53  ;;  %v327_v58 = vpack.c.bf16 %v297_v56, %v295_v55  ;;  %v294_v59 = vld [vmem:[%s1729_s13 + $0x80] sm:$0xff]  ;;  %v296_v60 = vld [vmem:[%s1729_s13 + $0x90] sm:$0xff]  ;;  %v299_v61 = vld [vmem:[%s1729_s13 + $0xa8] sm:$0xff]  ;;  %v378_v38 = vsub.s32 1, %v373_v37 }
  0x7a   : > { %551 = vmatpush1.bf16.msra.mxu0 %v1290_v9  ;;  %v301_v62 = vld [vmem:[%s1729_s13 + $0xb8] sm:$0xff]  ;;  %v326_v63 = vpack.c.bf16 %v296_v60, %v294_v59  ;;  %v298_v1 = vld [vmem:[%s1729_s13 + $0xa0] sm:$0xff]  ;;  %v300_v2 = vld [vmem:[%s1729_s13 + $0xb0] sm:$0xff] }
  0x7b   : > { %552 = vmatprep.subr.bf16.mxu0 %v1291_v10  ;;  %v329_v0 = vpack.c.bf16 %v301_v62, %v299_v61  ;;  %v303_v3 = vld [vmem:[%s1729_s13 + $0xc8] sm:$0xff]  ;;  %v305_v4 = vld [vmem:[%s1729_s13 + $0xd8] sm:$0xff]  ;;  %v328_v5 = vpack.c.bf16 %v300_v2, %v298_v1  ;;  %v302_v7 = vld [vmem:[%s1729_s13 + $0xc0] sm:$0xff] }
  0x7c   : > { %v331_v6 = vpack.c.bf16 %v305_v4, %v303_v3  ;;  %v304_v8 = vld [vmem:[%s1729_s13 + $0xd0] sm:$0xff]  ;;  %v307_v9 = vld [vmem:[%s1729_s13 + $0xe8] sm:$0xff]  ;;  %v309_v10 = vld [vmem:[%s1729_s13 + $0xf8] sm:$0xff] }
  0x7d   : > { %v306_v13 = vld [vmem:[%s1729_s13 + $0xe0] sm:$0xff]  ;;  %v308_v14 = vld [vmem:[%s1729_s13 + $0xf0] sm:$0xff]  ;;  %v311_v15 = vld [vmem:[%s1729_s13 + $0x108] sm:$0xff] }
  0x7e   : > { %553 = vmatpush1.bf16.msra.mxu0 %v1293_v11  ;;  %v330_v11 = vpack.c.bf16 %v304_v8, %v302_v7  ;;  %v1331_v35 = vld [vmem:[#allocation6 + $0x38] sm:$0xff]  }
  0x7f   : > { %554 = vmatprep.subr.bf16.mxu0 %v1294_v12  ;;  %v333_v12 = vpack.c.bf16 %v309_v10, %v307_v9 }
  0x82   : > { %555 = vmatpush1.bf16.msra.mxu0 %v1296_v16  ;;  %v313_v16 = vld [vmem:[%s1729_s13 + $0x118] sm:$0xff] }
  0x83   : > { %556 = vmatprep.subr.bf16.mxu0 %v1297_v17  ;;  %v332_v17 = vpack.c.bf16 %v308_v14, %v306_v13 }
  0x86   : > { %557 = vmatpush1.bf16.msra.mxu0 %v1299_v18  ;;  %v335_v18 = vpack.c.bf16 %v313_v16, %v311_v15 }
  0x87   : > { %558 = vmatprep.subr.bf16.mxu0 %v1300_v19  ;;  %v310_v19 = vld [vmem:[%s1729_s13 + $0x100] sm:$0xff] }
  0x8a   : > { %559 = vmatpush1.bf16.msra.mxu0 %v1302_v20  ;;  %v312_v20 = vld [vmem:[%s1729_s13 + $0x110] sm:$0xff] }
  0x8b   : > { %560 = vmatprep.subr.bf16.mxu0 %v1303_v21  ;;  %v315_v21 = vld [vmem:[%s1729_s13 + $0x128] sm:$0xff] }
  0x8e   : > { %561 = vmatpush1.bf16.msra.mxu0 %v1305_v22  ;;  %v317_v22 = vld [vmem:[%s1729_s13 + $0x138] sm:$0xff] }
  0x8f   : > { %562 = vmatprep.subr.bf16.mxu0 %v1306_v23  ;;  %v334_v23 = vpack.c.bf16 %v312_v20, %v310_v19 }
  0x92   : > { %563 = vmatpush1.bf16.msra.mxu0 %v1308_v24  ;;  %v337_v24 = vpack.c.bf16 %v317_v22, %v315_v21 }
  0x93   : > { %564 = vmatprep.subr.bf16.mxu0 %v1309_v25  ;;  %v314_v25 = vld [vmem:[%s1729_s13 + $0x120] sm:$0xff] }
  0x96   : > { %565 = vmatpush1.bf16.msra.mxu0 %v1311_v26  ;;  %v316_v26 = vld [vmem:[%s1729_s13 + $0x130] sm:$0xff] }
  0x97   : > { %566 = vmatprep.subr.bf16.mxu0 %v1312_v27  ;;  %v336_v27 = vpack.c.bf16 %v316_v26, %v314_v25 }
  0x9a   : > { %567 = vmatpush1.bf16.msra.mxu0 %v1314_v28  ;;  %v1324_v28 = vld [vmem:[#allocation6] sm:$0xff]  }
  0x9b   : > { %568 = vmatprep.subr.bf16.mxu0 %v1315_v29  ;;  %1172 = vmatprep.subr.bf16.mxu1 %v1324_v28  ;;  %v1325_v29 = vld [vmem:[#allocation6 + $0x8] sm:$0xff]  }
  0x9c   : > { %1173 = vmatpush3.bf16.msra.mxu1 %v1324_v28 }
  0x9d   : > { %1174 = vmatprep.subr.bf16.mxu1 %v1325_v29 }
  0x9e   : > { %569 = vmatpush1.bf16.msra.mxu0 %v1317_v30  ;;  %v1326_v30 = vld [vmem:[#allocation6 + $0x10] sm:$0xff]  }
  0x9f   : > { %570 = vmatprep.subr.bf16.mxu0 %v1318_v31  ;;  %v1327_v31 = vld [vmem:[#allocation6 + $0x18] sm:$0xff]  }
  0xa0   : > { %1175 = vmatpush3.bf16.msra.mxu1 %v1325_v29 }
  0xa1   : > { %1176 = vmatprep.subr.bf16.mxu1 %v1326_v30 }
  0xa2   : > { %571 = vmatpush1.bf16.msra.mxu0 %v1320_v32  ;;  %v1328_v32 = vld [vmem:[#allocation6 + $0x20] sm:$0xff]  }
  0xa3   : > { %572 = vmatprep.subr.bf16.mxu0 %v1321_v33  ;;  %v1329_v33 = vld [vmem:[#allocation6 + $0x28] sm:$0xff]  }
  0xa4   : > { %1177 = vmatpush3.bf16.msra.mxu1 %v1326_v30 }
  0xa5   : > { %1178 = vmatprep.subr.bf16.mxu1 %v1327_v31 }
  0xa6   : > { %573 = vmatpush1.bf16.msra.mxu0 %v1323_v34  ;;  %v1330_v34 = vld [vmem:[#allocation6 + $0x30] sm:$0xff]  }
  0xa8   : > { %1179 = vmatpush3.bf16.msra.mxu1 %v1327_v31 }
  0xa9   : > { %575 = vmatmul.mubr.bf16.vlgmr.msra.gmra.mrb[0].mxu0 %v318_v39  ;;  %1180 = vmatprep.subr.bf16.mxu1 %v1328_v32  ;;  %v370_v39 = vld [vmem:[%s1891_s2] sm:$0x3] }
  0xaa   : > { %584 = vmatprep.mubr.bf16.mxu0 %v321_v40  ;;  %v374_v40 = vsub.s32 0, %v373_v37  ;;  %v1782_v41 = vrot.slane %v370_v39, %v378_v38 }
  0xac   : > { %1181 = vmatpush3.bf16.msra.mxu1 %v1328_v32  ;;  %v1784_v44 = vrot.slane %v370_v39, %v374_v40 }
  0xad   : > { %1182 = vmatprep.subr.bf16.mxu1 %v1329_v33 }
  0xb0   : > { %1183 = vmatpush3.bf16.msra.mxu1 %v1329_v33 }
  0xb1   : > { %585 = vmatmul.mubr.bf16.gmra.mrb[4].mxu0 %v320_v45  ;;  %1184 = vmatprep.subr.bf16.mxu1 %v1330_v34 }
  0xb2   : > { %594 = vmatprep.mubr.bf16.mxu0 %v323_v46 }
  0xb4   : > { %1185 = vmatpush3.bf16.msra.mxu1 %v1330_v34 }
  0xb5   : > { %1186 = vmatprep.subr.bf16.mxu1 %v1331_v35 }
  0xb8   : > { %1187 = vmatpush3.bf16.msra.mxu1 %v1331_v35 }
  0xb9   : > { %595 = vmatmul.mubr.bf16.gmra.mrb[8].mxu0 %v322_v51 }
  0xba   : > { %604 = vmatprep.mubr.bf16.mxu0 %v325_v52 }
  0xc1   : > { %605 = vmatmul.mubr.bf16.gmra.mrb[12].mxu0 %v324_v57 }
  0xc2   : > { %614 = vmatprep.mubr.bf16.mxu0 %v327_v58 }
  0xc9   : > { %615 = vmatmul.mubr.bf16.gmra.mrb[16].mxu0 %v326_v63 }
  0xca   : > { %624 = vmatprep.mubr.bf16.mxu0 %v329_v0 }
  0xd1   : > { %625 = vmatmul.mubr.bf16.gmra.mrb[20].mxu0 %v328_v5 }
  0xd2   : > { %634 = vmatprep.mubr.bf16.mxu0 %v331_v6 }
  0xd9   : > { %635 = vmatmul.mubr.bf16.gmra.mrb[24].mxu0 %v330_v11 }
  0xda   : > { %644 = vmatprep.mubr.bf16.mxu0 %v333_v12 }
  0xe1   : > { %645 = vmatmul.mubr.bf16.gmra.mrb[28].mxu0 %v332_v17 }
  0xe2   : > { %654 = vmatprep.mubr.bf16.mxu0 %v335_v18 }
  0xe9   : > { %655 = vmatmul.mubr.bf16.gmra.mrb[32].mxu0 %v334_v23 }
  0xea   : > { %664 = vmatprep.mubr.bf16.mxu0 %v337_v24 }
  0xf1   : > { %665 = vmatmul.mubr.bf16.gmra.mrb[36].mxu0 %v336_v27 }
 0x17c   : > { %v576_v42 = vpop.f32.mrb[0].mxu0 }
 0x17d   : > { %v578_v43 = vpop.f32.mrb[1].mxu0  ;;  %v577_v50 = vadd.f32 %v576_v42, %v1784_v44 }
 0x17e   : > { %v579_v45 = vadd.f32 %v578_v43, %v1782_v41  ;;  %v580_v46 = vpop.f32.mrb[2].mxu0 }
 0x17f   : > { %v582_v47 = vpop.f32.mrb[3].mxu0  ;;  %v581_v52 = vadd.f32 %v580_v46, %v1784_v44 }
 0x180   : > { %v695_v48 = vmul.f32 0.5, %v579_v45  ;;  %v583_v49 = vadd.f32 %v582_v47, %v1782_v41 }
 0x182   : > { %1332 = vtanh.f32 %v695_v48  ;;  %v696_v51 = vmul.f32 0.5, %v583_v49 }
 0x184   : > { %1334 = vtanh.f32 %v696_v51  ;;  %v586_v53 = vpop.f32.mrb[4].mxu0 }
 0x185   : > { %v588_v54 = vpop.f32.mrb[5].mxu0  ;;  %1336 = vtanh.f32 %v577_v50  ;;  %v587_v60 = vadd.f32 %v586_v53, %v1784_v44 }
 0x186   : > { %v589_v55 = vadd.f32 %v588_v54, %v1782_v41  ;;  %v590_v56 = vpop.f32.mrb[6].mxu0  ;;  %1338 = vtanh.f32 %v581_v52 }
 0x187   : > { %v592_v57 = vpop.f32.mrb[7].mxu0  ;;  %v591_v63 = vadd.f32 %v590_v56, %v1784_v44 }
 0x188   : > { %v697_v58 = vmul.f32 0.5, %v589_v55  ;;  %v593_v59 = vadd.f32 %v592_v57, %v1782_v41 }
 0x18a   : > { %1340 = vtanh.f32 %v697_v58  ;;  %v698_v61 = vmul.f32 0.5, %v593_v59 }
 0x18c   : > { %v1333_v62 = vpop.eup %1332  ;;  %1342 = vtanh.f32 %v698_v61  ;;  %v596_v0 = vpop.f32.mrb[8].mxu0 }
 0x18d   : > { %v735_v1 = vadd.f32 1.0, %v1333_v62  ;;  %v598_v2 = vpop.f32.mrb[9].mxu0  ;;  %1344 = vtanh.f32 %v587_v60  ;;  %v597_v15 = vadd.f32 %v596_v0, %v1784_v44 }
 0x18e   : > { %v1335_v3 = vpop.eup %1334  ;;  %v599_v4 = vadd.f32 %v598_v2, %v1782_v41  ;;  %v600_v5 = vpop.f32.mrb[10].mxu0  ;;  %1346 = vtanh.f32 %v591_v63 }
 0x18f   : > { %v736_v6 = vadd.f32 1.0, %v1335_v3  ;;  %v602_v7 = vpop.f32.mrb[11].mxu0  ;;  %v755_v8 = vmul.f32 0.5, %v735_v1  ;;  %v1337_v9 = vpop.eup %1336  ;;  %v601_v19 = vadd.f32 %v600_v5, %v1784_v44 }
 0x190   : > { %v699_v10 = vmul.f32 0.5, %v599_v4  ;;  %v603_v11 = vadd.f32 %v602_v7, %v1782_v41  ;;  %v1339_v14 = vpop.eup %1338 }
 0x191   : > { %v756_v12 = vmul.f32 0.5, %v736_v6  ;;  %v775_v13 = vmul.f32 %v1337_v9, %v755_v8 }
 0x192   : > { %1348 = vtanh.f32 %v699_v10  ;;  %v700_v16 = vmul.f32 0.5, %v603_v11 }
 0x193   : > { %v776_v17 = vmul.f32 %v1339_v14, %v756_v12 }
 0x194   : > { %v1341_v18 = vpop.eup %1340  ;;  %1350 = vtanh.f32 %v700_v16  ;;  %v606_v20 = vpop.f32.mrb[12].mxu0 }
 0x195   : > { %v737_v21 = vadd.f32 1.0, %v1341_v18  ;;  %v608_v22 = vpop.f32.mrb[13].mxu0  ;;  %v795_v23 = vpack.c.bf16 %v776_v17, %v775_v13  ;;  %1352 = vtanh.f32 %v597_v15  ;;  %v607_v36 = vadd.f32 %v606_v20, %v1784_v44 }
 0x196   : > { %v1343_v24 = vpop.eup %1342  ;;  %v609_v25 = vadd.f32 %v608_v22, %v1782_v41  ;;  %v610_v26 = vpop.f32.mrb[14].mxu0  ;;  %1354 = vtanh.f32 %v601_v19 }
 0x197   : > { %v757_v27 = vmul.f32 0.5, %v737_v21  ;;  %v738_v28 = vadd.f32 1.0, %v1343_v24  ;;  %v612_v29 = vpop.f32.mrb[15].mxu0  ;;  %1188 = vmatprep.mubr.bf16.mxu1 %v795_v23  ;;  %v1345_v30 = vpop.eup %1344  ;;  %v611_v40 = vadd.f32 %v610_v26, %v1784_v44 }
 0x198   : > { %v701_v31 = vmul.f32 0.5, %v609_v25  ;;  %v613_v32 = vadd.f32 %v612_v29, %v1782_v41  ;;  %v1347_v35 = vpop.eup %1346 }
 0x199   : > { %v758_v33 = vmul.f32 0.5, %v738_v28  ;;  %v777_v34 = vmul.f32 %v1345_v30, %v757_v27 }
 0x19a   : > { %1356 = vtanh.f32 %v701_v31  ;;  %v702_v37 = vmul.f32 0.5, %v613_v32 }
 0x19b   : > { %v778_v38 = vmul.f32 %v1347_v35, %v758_v33 }
 0x19c   : > { %v1349_v39 = vpop.eup %1348  ;;  %1358 = vtanh.f32 %v702_v37  ;;  %v616_v42 = vpop.f32.mrb[16].mxu0 }
 0x19d   : > { %v739_v43 = vadd.f32 1.0, %v1349_v39  ;;  %v618_v45 = vpop.f32.mrb[17].mxu0  ;;  %v796_v46 = vpack.c.bf16 %v778_v38, %v777_v34  ;;  %1360 = vtanh.f32 %v607_v36  ;;  %v617_v59 = vadd.f32 %v616_v42, %v1784_v44 }
 0x19e   : > { %v1351_v47 = vpop.eup %1350  ;;  %v619_v48 = vadd.f32 %v618_v45, %v1782_v41  ;;  %v620_v49 = vpop.f32.mrb[18].mxu0  ;;  %1362 = vtanh.f32 %v611_v40 }
 0x19f   : > { %v759_v50 = vmul.f32 0.5, %v739_v43  ;;  %v740_v51 = vadd.f32 1.0, %v1351_v47  ;;  %v622_v52 = vpop.f32.mrb[19].mxu0  ;;  %1189 = vmatmul.mubr.bf16.vlgmr.msra.gmra.mrb[0].mxu1 %v796_v46  ;;  %v1353_v53 = vpop.eup %1352  ;;  %v621_v63 = vadd.f32 %v620_v49, %v1784_v44 }
 0x1a0   : > { %v703_v54 = vmul.f32 0.5, %v619_v48  ;;  %v623_v55 = vadd.f32 %v622_v52, %v1782_v41  ;;  %v1355_v58 = vpop.eup %1354 }
 0x1a1   : > { %v760_v56 = vmul.f32 0.5, %v740_v51  ;;  %v779_v57 = vmul.f32 %v1353_v53, %v759_v50 }
 0x1a2   : > { %1364 = vtanh.f32 %v703_v54  ;;  %v704_v60 = vmul.f32 0.5, %v623_v55 }
 0x1a3   : > { %v780_v61 = vmul.f32 %v1355_v58, %v760_v56 }
 0x1a4   : > { %v1357_v62 = vpop.eup %1356  ;;  %1366 = vtanh.f32 %v704_v60  ;;  %v626_v0 = vpop.f32.mrb[20].mxu0 }
 0x1a5   : > { %v741_v1 = vadd.f32 1.0, %v1357_v62  ;;  %v628_v2 = vpop.f32.mrb[21].mxu0  ;;  %v797_v3 = vpack.c.bf16 %v780_v61, %v779_v57  ;;  %1368 = vtanh.f32 %v617_v59  ;;  %v627_v16 = vadd.f32 %v626_v0, %v1784_v44 }
 0x1a6   : > { %v1359_v4 = vpop.eup %1358  ;;  %v629_v5 = vadd.f32 %v628_v2, %v1782_v41  ;;  %v630_v6 = vpop.f32.mrb[22].mxu0  ;;  %1370 = vtanh.f32 %v621_v63 }
 0x1a7   : > { %v761_v7 = vmul.f32 0.5, %v741_v1  ;;  %v742_v8 = vadd.f32 1.0, %v1359_v4  ;;  %v632_v9 = vpop.f32.mrb[23].mxu0  ;;  %1192 = vmatprep.mubr.bf16.mxu1 %v797_v3  ;;  %v1361_v10 = vpop.eup %1360  ;;  %v631_v20 = vadd.f32 %v630_v6, %v1784_v44 }
 0x1a8   : > { %v705_v11 = vmul.f32 0.5, %v629_v5  ;;  %v633_v12 = vadd.f32 %v632_v9, %v1782_v41  ;;  %v1363_v15 = vpop.eup %1362 }
 0x1a9   : > { %v762_v13 = vmul.f32 0.5, %v742_v8  ;;  %v781_v14 = vmul.f32 %v1361_v10, %v761_v7 }
 0x1aa   : > { %1372 = vtanh.f32 %v705_v11  ;;  %v706_v17 = vmul.f32 0.5, %v633_v12 }
 0x1ab   : > { %v782_v18 = vmul.f32 %v1363_v15, %v762_v13 }
 0x1ac   : > { %v1365_v19 = vpop.eup %1364  ;;  %1374 = vtanh.f32 %v706_v17  ;;  %v636_v21 = vpop.f32.mrb[24].mxu0 }
 0x1ad   : > { %v743_v22 = vadd.f32 1.0, %v1365_v19  ;;  %v638_v23 = vpop.f32.mrb[25].mxu0  ;;  %v798_v24 = vpack.c.bf16 %v782_v18, %v781_v14  ;;  %1376 = vtanh.f32 %v627_v16  ;;  %v637_v37 = vadd.f32 %v636_v21, %v1784_v44 }
 0x1ae   : > { %v1367_v25 = vpop.eup %1366  ;;  %v639_v26 = vadd.f32 %v638_v23, %v1782_v41  ;;  %v640_v27 = vpop.f32.mrb[26].mxu0  ;;  %1378 = vtanh.f32 %v631_v20 }
 0x1af   : > { %v763_v28 = vmul.f32 0.5, %v743_v22  ;;  %v744_v29 = vadd.f32 1.0, %v1367_v25  ;;  %v642_v30 = vpop.f32.mrb[27].mxu0  ;;  %1193 = vmatmul.mubr.bf16.gmra.mrb[4].mxu1 %v798_v24  ;;  %v1369_v31 = vpop.eup %1368  ;;  %v641_v42 = vadd.f32 %v640_v27, %v1784_v44 }
 0x1b0   : > { %v707_v32 = vmul.f32 0.5, %v639_v26  ;;  %v643_v33 = vadd.f32 %v642_v30, %v1782_v41  ;;  %v1371_v36 = vpop.eup %1370 }
 0x1b1   : > { %v764_v34 = vmul.f32 0.5, %v744_v29  ;;  %v783_v35 = vmul.f32 %v1369_v31, %v763_v28 }
 0x1b2   : > { %1380 = vtanh.f32 %v707_v32  ;;  %v708_v38 = vmul.f32 0.5, %v643_v33 }
 0x1b3   : > { %v784_v39 = vmul.f32 %v1371_v36, %v764_v34 }
 0x1b4   : > { %v1373_v40 = vpop.eup %1372  ;;  %1382 = vtanh.f32 %v708_v38  ;;  %v646_v43 = vpop.f32.mrb[28].mxu0 }
 0x1b5   : > { %v745_v45 = vadd.f32 1.0, %v1373_v40  ;;  %v648_v46 = vpop.f32.mrb[29].mxu0  ;;  %v799_v47 = vpack.c.bf16 %v784_v39, %v783_v35  ;;  %1384 = vtanh.f32 %v637_v37  ;;  %v647_v60 = vadd.f32 %v646_v43, %v1784_v44 }
 0x1b6   : > { %v1375_v48 = vpop.eup %1374  ;;  %v649_v49 = vadd.f32 %v648_v46, %v1782_v41  ;;  %v650_v50 = vpop.f32.mrb[30].mxu0  ;;  %1386 = vtanh.f32 %v641_v42 }
 0x1b7   : > { %v765_v51 = vmul.f32 0.5, %v745_v45  ;;  %v746_v52 = vadd.f32 1.0, %v1375_v48  ;;  %v652_v53 = vpop.f32.mrb[31].mxu0  ;;  %1196 = vmatprep.mubr.bf16.mxu1 %v799_v47  ;;  %v1377_v54 = vpop.eup %1376  ;;  %v651_v0 = vadd.f32 %v650_v50, %v1784_v44 }
 0x1b8   : > { %v709_v55 = vmul.f32 0.5, %v649_v49  ;;  %v653_v56 = vadd.f32 %v652_v53, %v1782_v41  ;;  %v1379_v59 = vpop.eup %1378 }
 0x1b9   : > { %v766_v57 = vmul.f32 0.5, %v746_v52  ;;  %v785_v58 = vmul.f32 %v1377_v54, %v765_v51 }
 0x1ba   : > { %1388 = vtanh.f32 %v709_v55  ;;  %v710_v61 = vmul.f32 0.5, %v653_v56 }
 0x1bb   : > { %v786_v62 = vmul.f32 %v1379_v59, %v766_v57 }
 0x1bc   : > { %v1381_v63 = vpop.eup %1380  ;;  %1390 = vtanh.f32 %v710_v61  ;;  %v656_v1 = vpop.f32.mrb[32].mxu0 }
 0x1bd   : > { %v747_v2 = vadd.f32 1.0, %v1381_v63  ;;  %v658_v3 = vpop.f32.mrb[33].mxu0  ;;  %v800_v4 = vpack.c.bf16 %v786_v62, %v785_v58  ;;  %1392 = vtanh.f32 %v647_v60  ;;  %v657_v17 = vadd.f32 %v656_v1, %v1784_v44  ;;  %v1140_v1 = vld [vmem:[%s1893_s4] ss:$0 sm:$0xff] }
 0x1be   : > { %v1383_v5 = vpop.eup %1382  ;;  %v659_v6 = vadd.f32 %v658_v3, %v1782_v41  ;;  %v660_v7 = vpop.f32.mrb[34].mxu0  ;;  %1394 = vtanh.f32 %v651_v0 }
 0x1bf   : > { %v767_v8 = vmul.f32 0.5, %v747_v2  ;;  %v748_v9 = vadd.f32 1.0, %v1383_v5  ;;  %v662_v10 = vpop.f32.mrb[35].mxu0  ;;  %1197 = vmatmul.mubr.bf16.gmra.mrb[8].mxu1 %v800_v4  ;;  %v1385_v11 = vpop.eup %1384  ;;  %v661_v21 = vadd.f32 %v660_v7, %v1784_v44 }
 0x1c0   : > { %v711_v12 = vmul.f32 0.5, %v659_v6  ;;  %v663_v13 = vadd.f32 %v662_v10, %v1782_v41  ;;  %v1387_v16 = vpop.eup %1386 }
 0x1c1   : > { %v768_v14 = vmul.f32 0.5, %v748_v9  ;;  %v787_v15 = vmul.f32 %v1385_v11, %v767_v8 }
 0x1c2   : > { %1396 = vtanh.f32 %v711_v12  ;;  %v712_v18 = vmul.f32 0.5, %v663_v13 }
 0x1c3   : > { %v788_v19 = vmul.f32 %v1387_v16, %v768_v14 }
 0x1c4   : > { %v1389_v20 = vpop.eup %1388  ;;  %1398 = vtanh.f32 %v712_v18  ;;  %v666_v22 = vpop.f32.mrb[36].mxu0 }
 0x1c5   : > { %v749_v23 = vadd.f32 1.0, %v1389_v20  ;;  %v668_v24 = vpop.f32.mrb[37].mxu0  ;;  %v801_v25 = vpack.c.bf16 %v788_v19, %v787_v15  ;;  %1400 = vtanh.f32 %v657_v17  ;;  %v667_v38 = vadd.f32 %v666_v22, %v1784_v44 }
 0x1c6   : > { %v1391_v26 = vpop.eup %1390  ;;  %v669_v27 = vadd.f32 %v668_v24, %v1782_v41  ;;  %v670_v28 = vpop.f32.mrb[38].mxu0  ;;  %1402 = vtanh.f32 %v661_v21 }
 0x1c7   : > { %v769_v29 = vmul.f32 0.5, %v749_v23  ;;  %v750_v30 = vadd.f32 1.0, %v1391_v26  ;;  %v672_v31 = vpop.f32.mrb[39].mxu0  ;;  %1200 = vmatprep.mubr.bf16.mxu1 %v801_v25  ;;  %v1393_v32 = vpop.eup %1392  ;;  %v671_v43 = vadd.f32 %v670_v28, %v1784_v44 }
 0x1c8   : > { %v713_v33 = vmul.f32 0.5, %v669_v27  ;;  %v673_v34 = vadd.f32 %v672_v31, %v1782_v41  ;;  %v1395_v37 = vpop.eup %1394 }
 0x1c9   : > { %v770_v35 = vmul.f32 0.5, %v750_v30  ;;  %v789_v36 = vmul.f32 %v1393_v32, %v769_v29 }
 0x1ca   : > { %1404 = vtanh.f32 %v713_v33  ;;  %v714_v39 = vmul.f32 0.5, %v673_v34 }
 0x1cb   : > { %v790_v40 = vmul.f32 %v1395_v37, %v770_v35 }
 0x1cc   : > { %v1397_v42 = vpop.eup %1396  ;;  %1406 = vtanh.f32 %v714_v39 }
 0x1cd   : > { %v751_v45 = vadd.f32 1.0, %v1397_v42  ;;  %v802_v46 = vpack.c.bf16 %v790_v40, %v789_v36  ;;  %1408 = vtanh.f32 %v667_v38 }
 0x1ce   : > { %v1399_v47 = vpop.eup %1398  ;;  %1410 = vtanh.f32 %v671_v43 }
 0x1cf   : > { %v771_v48 = vmul.f32 0.5, %v751_v45  ;;  %v752_v49 = vadd.f32 1.0, %v1399_v47  ;;  %1201 = vmatmul.mubr.bf16.gmra.mrb[12].mxu1 %v802_v46  ;;  %v1401_v41 = vpop.eup %1400 }
 0x1d0   : > { %v1403_v52 = vpop.eup %1402 }
 0x1d1   : > { %v772_v50 = vmul.f32 0.5, %v752_v49  ;;  %v791_v51 = vmul.f32 %v1401_v41, %v771_v48 }
 0x1d3   : > { %v792_v53 = vmul.f32 %v1403_v52, %v772_v50 }
 0x1d4   : > { %v1405_v54 = vpop.eup %1404 }
 0x1d5   : > { %v753_v55 = vadd.f32 1.0, %v1405_v54  ;;  %v803_v56 = vpack.c.bf16 %v792_v53, %v791_v51 }
 0x1d6   : > { %v1407_v57 = vpop.eup %1406 }
 0x1d7   : > { %v773_v44 = vmul.f32 0.5, %v753_v55  ;;  %v754_v58 = vadd.f32 1.0, %v1407_v57  ;;  %1204 = vmatprep.mubr.bf16.mxu1 %v803_v56  ;;  %v1409_v59 = vpop.eup %1408 }
 0x1d8   : > { %v1411_v62 = vpop.eup %1410 }
 0x1d9   : > { %v774_v60 = vmul.f32 0.5, %v754_v58  ;;  %v793_v61 = vmul.f32 %v1409_v59, %v773_v44 }
 0x1db   : > { %v794_v63 = vmul.f32 %v1411_v62, %v774_v60 }
 0x1dd   : > { %v804_v0 = vpack.c.bf16 %v794_v63, %v793_v61 }
 0x1df   : > { %1205 = vmatmul.mubr.bf16.gmra.mrb[16].mxu1 %v804_v0 }
 0x272   : > { %v1190_v2 = vpop.f32.mrb[0].mxu1 }
 0x273   : > { %v919_v3 = vadd.f32 %v1190_v2, %v1140_v1  ;;  %v910_v4 = vpop.f32.mrb[1].mxu1 }
 0x274   : > { %v911_v5 = vadd.f32 %v1140_v1, %v910_v4  ;;  %v1191_v6 = vpop.f32.mrb[2].mxu1 }
 0x275   : > { %992 = vst.msk [vmem:[%s1834_s16 + $0x10] sm:$0xff] %vm989_vm0, %v919_v3  ;;  %v922_v7 = vadd.f32 %v1191_v6, %v1140_v1  ;;  %v913_v8 = vpop.f32.mrb[3].mxu1 }
 0x276   : > { %990 = vst.msk [vmem:[%s1834_s16] sm:$0xff] %vm989_vm0, %v911_v5  ;;  %v914_v9 = vadd.f32 %v1140_v1, %v913_v8 }
 0x277   : > { %993 = vst.msk [vmem:[%s1834_s16 + $0x18] sm:$0xff] %vm989_vm0, %v922_v7 }
 0x278   : > { %991 = vst.msk [vmem:[%s1834_s16 + $0x8] sm:$0xff] %vm989_vm0, %v914_v9 }
 0x282   : > { %v1194_v10 = vpop.f32.mrb[4].mxu1 }
 0x283   : > { %v935_v11 = vadd.f32 %v1194_v10, %v1140_v1  ;;  %v926_v12 = vpop.f32.mrb[5].mxu1 }
 0x284   : > { %v927_v13 = vadd.f32 %v1140_v1, %v926_v12  ;;  %v1195_v14 = vpop.f32.mrb[6].mxu1 }
 0x285   : > { %996 = vst.msk [vmem:[%s1834_s16 + $0x30] sm:$0xff] %vm989_vm0, %v935_v11  ;;  %v938_v15 = vadd.f32 %v1195_v14, %v1140_v1  ;;  %v929_v16 = vpop.f32.mrb[7].mxu1 }
 0x286   : > { %994 = vst.msk [vmem:[%s1834_s16 + $0x20] sm:$0xff] %vm989_vm0, %v927_v13  ;;  %v930_v17 = vadd.f32 %v1140_v1, %v929_v16 }
 0x287   : > { %997 = vst.msk [vmem:[%s1834_s16 + $0x38] sm:$0xff] %vm989_vm0, %v938_v15 }
 0x288   : > { %995 = vst.msk [vmem:[%s1834_s16 + $0x28] sm:$0xff] %vm989_vm0, %v930_v17 }
 0x292   : > { %v1198_v18 = vpop.f32.mrb[8].mxu1 }
 0x293   : > { %v951_v19 = vadd.f32 %v1198_v18, %v1140_v1  ;;  %v942_v20 = vpop.f32.mrb[9].mxu1 }
 0x294   : > { %v943_v21 = vadd.f32 %v1140_v1, %v942_v20  ;;  %v1199_v22 = vpop.f32.mrb[10].mxu1 }
 0x295   : > { %1000 = vst.msk [vmem:[%s1834_s16 + $0x50] sm:$0xff] %vm989_vm0, %v951_v19  ;;  %v954_v23 = vadd.f32 %v1199_v22, %v1140_v1  ;;  %v945_v24 = vpop.f32.mrb[11].mxu1 }
 0x296   : > { %998 = vst.msk [vmem:[%s1834_s16 + $0x40] sm:$0xff] %vm989_vm0, %v943_v21  ;;  %v946_v25 = vadd.f32 %v1140_v1, %v945_v24 }
 0x297   : > { %1001 = vst.msk [vmem:[%s1834_s16 + $0x58] sm:$0xff] %vm989_vm0, %v954_v23 }
 0x298   : > { %999 = vst.msk [vmem:[%s1834_s16 + $0x48] sm:$0xff] %vm989_vm0, %v946_v25 }
 0x2a2   : > { %v1202_v26 = vpop.f32.mrb[12].mxu1 }
 0x2a3   : > { %v967_v27 = vadd.f32 %v1202_v26, %v1140_v1  ;;  %v958_v28 = vpop.f32.mrb[13].mxu1 }
 0x2a4   : > { %v959_v29 = vadd.f32 %v1140_v1, %v958_v28  ;;  %v1203_v30 = vpop.f32.mrb[14].mxu1 }
 0x2a5   : > { %1004 = vst.msk [vmem:[%s1834_s16 + $0x70] sm:$0xff] %vm989_vm0, %v967_v27  ;;  %v970_v31 = vadd.f32 %v1203_v30, %v1140_v1  ;;  %v961_v32 = vpop.f32.mrb[15].mxu1 }
 0x2a6   : > { %1002 = vst.msk [vmem:[%s1834_s16 + $0x60] sm:$0xff] %vm989_vm0, %v959_v29  ;;  %v962_v33 = vadd.f32 %v1140_v1, %v961_v32 }
 0x2a7   : > { %1005 = vst.msk [vmem:[%s1834_s16 + $0x78] sm:$0xff] %vm989_vm0, %v970_v31 }
 0x2a8   : > { %1003 = vst.msk [vmem:[%s1834_s16 + $0x68] sm:$0xff] %vm989_vm0, %v962_v33 }
 0x2b2   : > { %v1206_v34 = vpop.f32.mrb[16].mxu1 }
 0x2b3   : > { %v983_v35 = vadd.f32 %v1206_v34, %v1140_v1  ;;  %v974_v36 = vpop.f32.mrb[17].mxu1 }
 0x2b4   : > { %v975_v37 = vadd.f32 %v1140_v1, %v974_v36  ;;  %v1207_v38 = vpop.f32.mrb[18].mxu1 }
 0x2b5   : > { %1008 = vst.msk [vmem:[%s1834_s16 + $0x90] sm:$0xff] %vm989_vm0, %v983_v35  ;;  %v986_v39 = vadd.f32 %v1207_v38, %v1140_v1  ;;  %v977_v40 = vpop.f32.mrb[19].mxu1 }
 0x2b6   : > { %1006 = vst.msk [vmem:[%s1834_s16 + $0x80] sm:$0xff] %vm989_vm0, %v975_v37  ;;  %v978_v42 = vadd.f32 %v1140_v1, %v977_v40 }
 0x2b7   : > { %1009 = vst.msk [vmem:[%s1834_s16 + $0x98] sm:$0xff] %vm989_vm0, %v986_v39 }
 0x2b8   : > { %1007 = vst.msk [vmem:[%s1834_s16 + $0x88] sm:$0xff] %vm989_vm0, %v978_v42 }
 0x2b9 PF: > { %p16_p6 = scmp.ge.s32.totalorder %s1673_s14, 4   ;;  %s1907_s18 = smov %s1528_s19 }
 0x2ba   : > { %s1908_s19 = smov %s1532_s20  ;;  %s1909_s20 = smov %s1682_s17 }
 0x2bb   : > { %s1910_s21 = smov %s1673_s14  ;;  %18 = sbr.rel (!%p16_p6) target bundleno = 4 (0x4), region = 88 }
 0x2c2   :  { %1032 = vsyncpa [#allocation3], 1 }
 0x2c3   :  { %1034 = vsyncpa [#allocation3 + $0x1], 1 }
 0x2c4   :  { %1035 = vsyncpa [#allocation5], 1 }

</bundles_post_ra>
